<compile_context>
chip_gen: v6e
topology: v6e:2x2x1
jax: 0.10.0
libtpu: 0.0.40
codegen_flags: <defaults>
</compile_context>

<pallas_src>
import functools

import jax
import jax.numpy as jnp
from jax.experimental import pallas as pl
from jax.experimental.pallas import tpu as pltpu

INPUT_DIM = 28
HIDDEN_DIM = 100
LAYER_DIM = 2      # kernel hard-codes the 2 stacked RNN layers of the module
OUTPUT_DIM = 10

_SUBLANE = 8
_LANE = 128


def _round_up(n, m):
    return ((n + m - 1) // m) * m


def _rnna_kernel(x_ref,
                 w0_ref, b0_ref,        # layer 0: packed [W_ih; W_hh], b_ih + b_hh
                 w1_ref, b1_ref,        # layer 1: packed [W_ih; W_hh], b_ih + b_hh
                 wfc_ref, bfc_ref,      # final Linear
                 out_ref,
                 h1_ref, h2_ref,
                 *, t_total, t_blk, masked):
    blk = pl.program_id(0)

    # h0 = zeros (matches Variable(torch.zeros(layer_dim, B, H)))
    @pl.when(blk == 0)
    def _():
        h1_ref[...] = jnp.zeros_like(h1_ref)
        h2_ref[...] = jnp.zeros_like(h2_ref)

    bp, hp = h1_ref.shape

    # Hoisted: weight loads and bias broadcasts stay out of the serial time loop.
    w0 = w0_ref[...]
    w1 = w1_ref[...]
    b0 = jnp.broadcast_to(b0_ref[...], (bp, hp))
    b1 = jnp.broadcast_to(b1_ref[...], (bp, hp))

    h1 = h1_ref[...]
    h2 = h2_ref[...]

    # Fully unrolled time loop over this block (T_BLK is small and static); equivalent to
    # lax.fori_loop(..., unroll=True) and keeps the whole recurrence visible to the scheduler.
    for i in range(t_blk):
        xt = x_ref[i]                                            # (B_pad, D_pad)

        # layer 0: h1 = tanh([x_t, h1] @ [W_ih0; W_hh0] + (b_ih0 + b_hh0))
        z0 = jnp.concatenate([xt, h1], axis=-1)
        h1_new = jnp.tanh(
            jnp.dot(z0, w0, preferred_element_type=jnp.float32) + b0)

        # layer 1: h2 = tanh([h1, h2] @ [W_ih1; W_hh1] + (b_ih1 + b_hh1))
        z1 = jnp.concatenate([h1_new, h2], axis=-1)
        h2_new = jnp.tanh(
            jnp.dot(z1, w1, preferred_element_type=jnp.float32) + b1)

        if masked:
            # Only the last grid block can contain padded time steps; keep state unchanged there.
            valid = (blk * t_blk + i) < t_total
            h1 = jnp.where(valid, h1_new, h1)
            h2 = jnp.where(valid, h2_new, h2)
        else:
            h1 = h1_new
            h2 = h2_new

    h1_ref[...] = h1
    h2_ref[...] = h2

    # fc applied to out[:, -1, :] == last hidden state of the top layer
    @pl.when(blk == pl.num_programs(0) - 1)
    def _():
        out_ref[...] = (
            jnp.dot(h2, wfc_ref[...], preferred_element_type=jnp.float32)
            + bfc_ref[...])


def rnna_forward(x, p, *, t_blk_max=32):
    """x: (B, T, INPUT_DIM) float32, batch-first like the PyTorch module. Returns (B, OUTPUT_DIM)."""
    B, T, D = x.shape
    H = p["w_hh0_t"].shape[0]
    O = p["w_fc_t"].shape[1]

    B_pad = _round_up(B, _SUBLANE)
    D_pad = _round_up(D, _LANE)
    H_pad = _round_up(H, _LANE)
    O_pad = _round_up(O, _LANE)

    t_blk = T if T <= t_blk_max else t_blk_max
    T_pad = _round_up(T, t_blk)
    num_blks = T_pad // t_blk
    masked = (T_pad != T)

    f32 = jnp.float32

    # --- Pack + pad weights (zero-padded cols/rows keep padded hidden lanes exactly 0) ---
    # layer 0: [W_ih0; W_hh0] -> (D_pad + H_pad, H_pad), bias b_ih0 + b_hh0 -> (1, H_pad)
    w0 = jnp.zeros((D_pad + H_pad, H_pad), f32)
    w0 = w0.at[:D, :H].set(p["w_ih0_t"]).at[D_pad:D_pad + H, :H].set(p["w_hh0_t"])
    b0 = jnp.zeros((1, H_pad), f32).at[:, :H].set(p["b_ih0"] + p["b_hh0"])
    # layer 1: [W_ih1; W_hh1] -> (2*H_pad, H_pad)
    w1 = jnp.zeros((2 * H_pad, H_pad), f32)
    w1 = w1.at[:H, :H].set(p["w_ih1_t"]).at[H_pad:H_pad + H, :H].set(p["w_hh1_t"])
    b1 = jnp.zeros((1, H_pad), f32).at[:, :H].set(p["b_ih1"] + p["b_hh1"])
    # fc
    wfc = jnp.zeros((H_pad, O_pad), f32).at[:H, :O].set(p["w_fc_t"])
    bfc = jnp.zeros((1, O_pad), f32).at[:, :O].set(p["b_fc"])

    # --- Time-major, zero-padded input: (T_pad, B_pad, D_pad) ---
    x_tm = jnp.zeros((T_pad, B_pad, D_pad), f32)
    x_tm = x_tm.at[:T, :B, :D].set(jnp.transpose(x, (1, 0, 2)))

    kernel = functools.partial(_rnna_kernel, t_total=T, t_blk=t_blk, masked=masked)

    grid_spec = pltpu.PrefetchScalarGridSpec(
        num_scalar_prefetch=0,
        grid=(num_blks,),
        in_specs=[
            pl.BlockSpec((t_blk, B_pad, D_pad), lambda b: (b, 0, 0)),   # x time block
            pl.BlockSpec((D_pad + H_pad, H_pad), lambda b: (0, 0)),      # packed W layer 0
            pl.BlockSpec((1, H_pad), lambda b: (0, 0)),                  # fused bias layer 0
            pl.BlockSpec((2 * H_pad, H_pad), lambda b: (0, 0)),          # packed W layer 1
            pl.BlockSpec((1, H_pad), lambda b: (0, 0)),                  # fused bias layer 1
            pl.BlockSpec((H_pad, O_pad), lambda b: (0, 0)),              # fc weight
            pl.BlockSpec((1, O_pad), lambda b: (0, 0)),                  # fc bias
        ],
        out_specs=pl.BlockSpec((B_pad, O_pad), lambda b: (0, 0)),        # resident, lane-dense
        scratch_shapes=[
            pltpu.VMEM((B_pad, H_pad), f32),                             # h1 (layer 0 hidden)
            pltpu.VMEM((B_pad, H_pad), f32),                             # h2 (layer 1 hidden)
        ],
    )

    out = pl.pallas_call(
        kernel,
        out_shape=jax.ShapeDtypeStruct((B_pad, O_pad), f32),
        grid_spec=grid_spec,
        compiler_params=pltpu.CompilerParams(
            dimension_semantics=("arbitrary",)),   # recurrence -> sequential grid axis
    )(x_tm, w0, b0, w1, b1, wfc, bfc)

    return out[:B, :O]


def init_params(key, input_dim=INPUT_DIM, hidden_dim=HIDDEN_DIM, output_dim=OUTPUT_DIM):
    """Deterministic init matching PyTorch shapes (stored pre-transposed for x @ W)."""
    ks = jax.random.split(key, 11)
    bound = 1.0 / float(jnp.sqrt(hidden_dim))

    def u(k, shape):
        return jax.random.uniform(k, shape, jnp.float32, -bound, bound)

    return {
        # nn.RNN layer 0: weight_ih_l0 (H, D), weight_hh_l0 (H, H), biases (H,)
        "w_ih0_t": u(ks[0], (input_dim, hidden_dim)),
        "w_hh0_t": u(ks[1], (hidden_dim, hidden_dim)),
        "b_ih0":   u(ks[2], (1, hidden_dim)),
        "b_hh0":   u(ks[3], (1, hidden_dim)),
        # nn.RNN layer 1: weight_ih_l1 (H, H), weight_hh_l1 (H, H), biases (H,)
        "w_ih1_t": u(ks[4], (hidden_dim, hidden_dim)),
        "w_hh1_t": u(ks[5], (hidden_dim, hidden_dim)),
        "b_ih1":   u(ks[6], (1, hidden_dim)),
        "b_hh1":   u(ks[7], (1, hidden_dim)),
        # nn.Linear(hidden_dim, output_dim)
        "w_fc_t":  u(ks[8], (hidden_dim, output_dim)),
        "b_fc":    u(ks[9], (1, output_dim)),
    }


def rnna_reference(x, p):
    """Pure-JAX reference matching nn.RNN(tanh, 2 layers, batch_first) + fc."""
    B, T, _ = x.shape
    H = p["w_hh0_t"].shape[0]
    h1 = jnp.zeros((B, H), jnp.float32)
    h2 = jnp.zeros((B, H), jnp.float32)
    for t in range(T):
        xt = x[:, t, :]
        h1 = jnp.tanh(xt @ p["w_ih0_t"] + p["b_ih0"] + h1 @ p["w_hh0_t"] + p["b_hh0"])
        h2 = jnp.tanh(h1 @ p["w_ih1_t"] + p["b_ih1"] + h2 @ p["w_hh1_t"] + p["b_hh1"])
    return h2 @ p["w_fc_t"] + p["b_fc"]


if __name__ == "__main__":
    key = jax.random.PRNGKey(0)
    k_x, k_p = jax.random.split(key)

    B, T = 2, 8
    x = jax.random.normal(k_x, (B, T, INPUT_DIM), jnp.float32)
    params = init_params(k_p)

    out = rnna_forward(x, params)
    out = jax.block_until_ready(out)

    ref = rnna_reference(x, params)
    assert out.shape == (B, OUTPUT_DIM)
    assert jnp.allclose(out, ref, atol=1e-4, rtol=1e-4), (
        f"max abs err = {jnp.max(jnp.abs(out - ref))}")

    print("KERNEL_OK")
</pallas_src>

<mosaic_0001>
module attributes {stable_mosaic.version = 11 : i64} {
  func.func @_rnna_kernel(%arg0: i32, %arg1: memref<8x8x128xf32, #tpu.memory_space<vmem>>, %arg2: memref<256x128xf32, #tpu.memory_space<vmem>>, %arg3: memref<1x128xf32, #tpu.memory_space<vmem>>, %arg4: memref<256x128xf32, #tpu.memory_space<vmem>>, %arg5: memref<1x128xf32, #tpu.memory_space<vmem>>, %arg6: memref<128x128xf32, #tpu.memory_space<vmem>>, %arg7: memref<1x128xf32, #tpu.memory_space<vmem>>, %arg8: memref<8x128xf32, #tpu.memory_space<vmem>>, %arg9: memref<8x128xf32, #tpu.memory_space<vmem>>, %arg10: memref<8x128xf32, #tpu.memory_space<vmem>>) attributes {dimension_semantics = [#tpu.dimension_semantics<arbitrary>], iteration_bounds = array<i64: 1>, scalar_prefetch = 0 : i64, scratch_operands = 2 : i64, tpu.core_type = #tpu.core_type<tc>, window_params = [{transform_indices = @transform_0, window_bounds = array<i64: 8, 8, 128>}, {pipeline_mode = #tpu.pipeline_mode<synchronous>, transform_indices = @transform_1, window_bounds = array<i64: 256, 128>}, {pipeline_mode = #tpu.pipeline_mode<synchronous>, transform_indices = @transform_2, window_bounds = array<i64: 1, 128>}, {pipeline_mode = #tpu.pipeline_mode<synchronous>, transform_indices = @transform_3, window_bounds = array<i64: 256, 128>}, {pipeline_mode = #tpu.pipeline_mode<synchronous>, transform_indices = @transform_4, window_bounds = array<i64: 1, 128>}, {pipeline_mode = #tpu.pipeline_mode<synchronous>, transform_indices = @transform_5, window_bounds = array<i64: 128, 128>}, {pipeline_mode = #tpu.pipeline_mode<synchronous>, transform_indices = @transform_6, window_bounds = array<i64: 1, 128>}, {pipeline_mode = #tpu.pipeline_mode<synchronous>, transform_indices = @transform_7, window_bounds = array<i64: 8, 128>}]} {
    %c0_i32 = arith.constant 0 : i32
    %0 = arith.cmpi eq, %arg0, %c0_i32 : i32
    %1 = arith.extui %0 : i1 to i32
    %c0_i32_0 = arith.constant 0 : i32
    %2 = arith.cmpi ne, %1, %c0_i32_0 : i32
    scf.if %2 {
      %cst_50 = arith.constant 0.000000e+00 : f32
      %98 = vector.broadcast %cst_50 : f32 to vector<8x128xf32>
      %c0_51 = arith.constant 0 : index
      %c0_52 = arith.constant 0 : index
      %99 = vector.load %arg9[%c0_51, %c0_52] : memref<8x128xf32, #tpu.memory_space<vmem>>, vector<8x128xf32>
      tpu.vector_store %arg9[%c0_51, %c0_52], %98 {strides = array<i32>} : memref<8x128xf32, #tpu.memory_space<vmem>>, vector<8x128xf32>,
      %cst_53 = arith.constant 0.000000e+00 : f32
      %100 = vector.broadcast %cst_53 : f32 to vector<8x128xf32>
      %c0_54 = arith.constant 0 : index
      %c0_55 = arith.constant 0 : index
      %101 = vector.load %arg10[%c0_54, %c0_55] : memref<8x128xf32, #tpu.memory_space<vmem>>, vector<8x128xf32>
      tpu.vector_store %arg10[%c0_54, %c0_55], %100 {strides = array<i32>} : memref<8x128xf32, #tpu.memory_space<vmem>>, vector<8x128xf32>,
    } else {
    }
    %c0 = arith.constant 0 : index
    %c0_1 = arith.constant 0 : index
    %3 = vector.load %arg2[%c0, %c0_1] : memref<256x128xf32, #tpu.memory_space<vmem>>, vector<256x128xf32>
    %c0_2 = arith.constant 0 : index
    %c0_3 = arith.constant 0 : index
    %4 = vector.load %arg4[%c0_2, %c0_3] : memref<256x128xf32, #tpu.memory_space<vmem>>, vector<256x128xf32>
    %c0_4 = arith.constant 0 : index
    %c0_5 = arith.constant 0 : index
    %5 = vector.load %arg3[%c0_4, %c0_5] : memref<1x128xf32, #tpu.memory_space<vmem>>, vector<1x128xf32>
    %6 = vector.shape_cast %5 : vector<1x128xf32> to vector<1x128xf32>
    %7 = vector.broadcast %6 : vector<1x128xf32> to vector<8x128xf32>
    %c0_6 = arith.constant 0 : index
    %c0_7 = arith.constant 0 : index
    %8 = vector.load %arg5[%c0_6, %c0_7] : memref<1x128xf32, #tpu.memory_space<vmem>>, vector<1x128xf32>
    %9 = vector.shape_cast %8 : vector<1x128xf32> to vector<1x128xf32>
    %10 = vector.broadcast %9 : vector<1x128xf32> to vector<8x128xf32>
    %c0_8 = arith.constant 0 : index
    %c0_9 = arith.constant 0 : index
    %11 = vector.load %arg9[%c0_8, %c0_9] : memref<8x128xf32, #tpu.memory_space<vmem>>, vector<8x128xf32>
    %c0_10 = arith.constant 0 : index
    %c0_11 = arith.constant 0 : index
    %12 = vector.load %arg10[%c0_10, %c0_11] : memref<8x128xf32, #tpu.memory_space<vmem>>, vector<8x128xf32>
    %c0_12 = arith.constant 0 : index
    %c0_13 = arith.constant 0 : index
    %c0_14 = arith.constant 0 : index
    %13 = vector.load %arg1[%c0_12, %c0_13, %c0_14] : memref<8x8x128xf32, #tpu.memory_space<vmem>>, vector<1x8x128xf32>
    %14 = vector.shape_cast %13 : vector<1x8x128xf32> to vector<8x128xf32>
    %15 = tpu.concatenate %14, %11 in 1 : vector<8x128xf32>, vector<8x128xf32> -> vector<8x256xf32>
    %cst = arith.constant dense<0.000000e+00> : vector<8x128xf32>
    %16 = tpu.matmul %15, %3, %cst {dimension_numbers = #tpu.dot_dimension_numbers<[1], [0], [0], [1], [0, 0, 1, 1], [], []>} : vector<8x256xf32>, vector<256x128xf32>, vector<8x128xf32> -> vector<8x128xf32>
    %17 = arith.addf %16, %7 : vector<8x128xf32>
    %18 = math.tanh %17 : vector<8x128xf32>
    %19 = tpu.concatenate %18, %12 in 1 : vector<8x128xf32>, vector<8x128xf32> -> vector<8x256xf32>
    %cst_15 = arith.constant dense<0.000000e+00> : vector<8x128xf32>
    %20 = tpu.matmul %19, %4, %cst_15 {dimension_numbers = #tpu.dot_dimension_numbers<[1], [0], [0], [1], [0, 0, 1, 1], [], []>} : vector<8x256xf32>, vector<256x128xf32>, vector<8x128xf32> -> vector<8x128xf32>
    %21 = arith.addf %20, %10 : vector<8x128xf32>
    %22 = math.tanh %21 : vector<8x128xf32>
    %c1 = arith.constant 1 : index
    %c0_16 = arith.constant 0 : index
    %c0_17 = arith.constant 0 : index
    %23 = vector.load %arg1[%c1, %c0_16, %c0_17] : memref<8x8x128xf32, #tpu.memory_space<vmem>>, vector<1x8x128xf32>
    %24 = vector.shape_cast %23 : vector<1x8x128xf32> to vector<8x128xf32>
    %25 = tpu.concatenate %24, %18 in 1 : vector<8x128xf32>, vector<8x128xf32> -> vector<8x256xf32>
    %cst_18 = arith.constant dense<0.000000e+00> : vector<8x128xf32>
    %26 = tpu.matmul %25, %3, %cst_18 {dimension_numbers = #tpu.dot_dimension_numbers<[1], [0], [0], [1], [0, 0, 1, 1], [], []>} : vector<8x256xf32>, vector<256x128xf32>, vector<8x128xf32> -> vector<8x128xf32>
    %27 = arith.addf %26, %7 : vector<8x128xf32>
    %28 = math.tanh %27 : vector<8x128xf32>
    %29 = tpu.concatenate %28, %22 in 1 : vector<8x128xf32>, vector<8x128xf32> -> vector<8x256xf32>
    %cst_19 = arith.constant dense<0.000000e+00> : vector<8x128xf32>
    %30 = tpu.matmul %29, %4, %cst_19 {dimension_numbers = #tpu.dot_dimension_numbers<[1], [0], [0], [1], [0, 0, 1, 1], [], []>} : vector<8x256xf32>, vector<256x128xf32>, vector<8x128xf32> -> vector<8x128xf32>
    %31 = arith.addf %30, %10 : vector<8x128xf32>
    %32 = math.tanh %31 : vector<8x128xf32>
    %c2 = arith.constant 2 : index
    %c0_20 = arith.constant 0 : index
    %c0_21 = arith.constant 0 : index
    %33 = vector.load %arg1[%c2, %c0_20, %c0_21] : memref<8x8x128xf32, #tpu.memory_space<vmem>>, vector<1x8x128xf32>
    %34 = vector.shape_cast %33 : vector<1x8x128xf32> to vector<8x128xf32>
    %35 = tpu.concatenate %34, %28 in 1 : vector<8x128xf32>, vector<8x128xf32> -> vector<8x256xf32>
    %cst_22 = arith.constant dense<0.000000e+00> : vector<8x128xf32>
    %36 = tpu.matmul %35, %3, %cst_22 {dimension_numbers = #tpu.dot_dimension_numbers<[1], [0], [0], [1], [0, 0, 1, 1], [], []>} : vector<8x256xf32>, vector<256x128xf32>, vector<8x128xf32> -> vector<8x128xf32>
    %37 = arith.addf %36, %7 : vector<8x128xf32>
    %38 = math.tanh %37 : vector<8x128xf32>
    %39 = tpu.concatenate %38, %32 in 1 : vector<8x128xf32>, vector<8x128xf32> -> vector<8x256xf32>
    %cst_23 = arith.constant dense<0.000000e+00> : vector<8x128xf32>
    %40 = tpu.matmul %39, %4, %cst_23 {dimension_numbers = #tpu.dot_dimension_numbers<[1], [0], [0], [1], [0, 0, 1, 1], [], []>} : vector<8x256xf32>, vector<256x128xf32>, vector<8x128xf32> -> vector<8x128xf32>
    %41 = arith.addf %40, %10 : vector<8x128xf32>
    %42 = math.tanh %41 : vector<8x128xf32>
    %c3 = arith.constant 3 : index
    %c0_24 = arith.constant 0 : index
    %c0_25 = arith.constant 0 : index
    %43 = vector.load %arg1[%c3, %c0_24, %c0_25] : memref<8x8x128xf32, #tpu.memory_space<vmem>>, vector<1x8x128xf32>
    %44 = vector.shape_cast %43 : vector<1x8x128xf32> to vector<8x128xf32>
    %45 = tpu.concatenate %44, %38 in 1 : vector<8x128xf32>, vector<8x128xf32> -> vector<8x256xf32>
    %cst_26 = arith.constant dense<0.000000e+00> : vector<8x128xf32>
    %46 = tpu.matmul %45, %3, %cst_26 {dimension_numbers = #tpu.dot_dimension_numbers<[1], [0], [0], [1], [0, 0, 1, 1], [], []>} : vector<8x256xf32>, vector<256x128xf32>, vector<8x128xf32> -> vector<8x128xf32>
    %47 = arith.addf %46, %7 : vector<8x128xf32>
    %48 = math.tanh %47 : vector<8x128xf32>
    %49 = tpu.concatenate %48, %42 in 1 : vector<8x128xf32>, vector<8x128xf32> -> vector<8x256xf32>
    %cst_27 = arith.constant dense<0.000000e+00> : vector<8x128xf32>
    %50 = tpu.matmul %49, %4, %cst_27 {dimension_numbers = #tpu.dot_dimension_numbers<[1], [0], [0], [1], [0, 0, 1, 1], [], []>} : vector<8x256xf32>, vector<256x128xf32>, vector<8x128xf32> -> vector<8x128xf32>
    %51 = arith.addf %50, %10 : vector<8x128xf32>
    %52 = math.tanh %51 : vector<8x128xf32>
    %c4 = arith.constant 4 : index
    %c0_28 = arith.constant 0 : index
    %c0_29 = arith.constant 0 : index
    %53 = vector.load %arg1[%c4, %c0_28, %c0_29] : memref<8x8x128xf32, #tpu.memory_space<vmem>>, vector<1x8x128xf32>
    %54 = vector.shape_cast %53 : vector<1x8x128xf32> to vector<8x128xf32>
    %55 = tpu.concatenate %54, %48 in 1 : vector<8x128xf32>, vector<8x128xf32> -> vector<8x256xf32>
    %cst_30 = arith.constant dense<0.000000e+00> : vector<8x128xf32>
    %56 = tpu.matmul %55, %3, %cst_30 {dimension_numbers = #tpu.dot_dimension_numbers<[1], [0], [0], [1], [0, 0, 1, 1], [], []>} : vector<8x256xf32>, vector<256x128xf32>, vector<8x128xf32> -> vector<8x128xf32>
    %57 = arith.addf %56, %7 : vector<8x128xf32>
    %58 = math.tanh %57 : vector<8x128xf32>
    %59 = tpu.concatenate %58, %52 in 1 : vector<8x128xf32>, vector<8x128xf32> -> vector<8x256xf32>
    %cst_31 = arith.constant dense<0.000000e+00> : vector<8x128xf32>
    %60 = tpu.matmul %59, %4, %cst_31 {dimension_numbers = #tpu.dot_dimension_numbers<[1], [0], [0], [1], [0, 0, 1, 1], [], []>} : vector<8x256xf32>, vector<256x128xf32>, vector<8x128xf32> -> vector<8x128xf32>
    %61 = arith.addf %60, %10 : vector<8x128xf32>
    %62 = math.tanh %61 : vector<8x128xf32>
    %c5 = arith.constant 5 : index
    %c0_32 = arith.constant 0 : index
    %c0_33 = arith.constant 0 : index
    %63 = vector.load %arg1[%c5, %c0_32, %c0_33] : memref<8x8x128xf32, #tpu.memory_space<vmem>>, vector<1x8x128xf32>
    %64 = vector.shape_cast %63 : vector<1x8x128xf32> to vector<8x128xf32>
    %65 = tpu.concatenate %64, %58 in 1 : vector<8x128xf32>, vector<8x128xf32> -> vector<8x256xf32>
    %cst_34 = arith.constant dense<0.000000e+00> : vector<8x128xf32>
    %66 = tpu.matmul %65, %3, %cst_34 {dimension_numbers = #tpu.dot_dimension_numbers<[1], [0], [0], [1], [0, 0, 1, 1], [], []>} : vector<8x256xf32>, vector<256x128xf32>, vector<8x128xf32> -> vector<8x128xf32>
    %67 = arith.addf %66, %7 : vector<8x128xf32>
    %68 = math.tanh %67 : vector<8x128xf32>
    %69 = tpu.concatenate %68, %62 in 1 : vector<8x128xf32>, vector<8x128xf32> -> vector<8x256xf32>
    %cst_35 = arith.constant dense<0.000000e+00> : vector<8x128xf32>
    %70 = tpu.matmul %69, %4, %cst_35 {dimension_numbers = #tpu.dot_dimension_numbers<[1], [0], [0], [1], [0, 0, 1, 1], [], []>} : vector<8x256xf32>, vector<256x128xf32>, vector<8x128xf32> -> vector<8x128xf32>
    %71 = arith.addf %70, %10 : vector<8x128xf32>
    %72 = math.tanh %71 : vector<8x128xf32>
    %c6 = arith.constant 6 : index
    %c0_36 = arith.constant 0 : index
    %c0_37 = arith.constant 0 : index
    %73 = vector.load %arg1[%c6, %c0_36, %c0_37] : memref<8x8x128xf32, #tpu.memory_space<vmem>>, vector<1x8x128xf32>
    %74 = vector.shape_cast %73 : vector<1x8x128xf32> to vector<8x128xf32>
    %75 = tpu.concatenate %74, %68 in 1 : vector<8x128xf32>, vector<8x128xf32> -> vector<8x256xf32>
    %cst_38 = arith.constant dense<0.000000e+00> : vector<8x128xf32>
    %76 = tpu.matmul %75, %3, %cst_38 {dimension_numbers = #tpu.dot_dimension_numbers<[1], [0], [0], [1], [0, 0, 1, 1], [], []>} : vector<8x256xf32>, vector<256x128xf32>, vector<8x128xf32> -> vector<8x128xf32>
    %77 = arith.addf %76, %7 : vector<8x128xf32>
    %78 = math.tanh %77 : vector<8x128xf32>
    %79 = tpu.concatenate %78, %72 in 1 : vector<8x128xf32>, vector<8x128xf32> -> vector<8x256xf32>
    %cst_39 = arith.constant dense<0.000000e+00> : vector<8x128xf32>
    %80 = tpu.matmul %79, %4, %cst_39 {dimension_numbers = #tpu.dot_dimension_numbers<[1], [0], [0], [1], [0, 0, 1, 1], [], []>} : vector<8x256xf32>, vector<256x128xf32>, vector<8x128xf32> -> vector<8x128xf32>
    %81 = arith.addf %80, %10 : vector<8x128xf32>
    %82 = math.tanh %81 : vector<8x128xf32>
    %c7 = arith.constant 7 : index
    %c0_40 = arith.constant 0 : index
    %c0_41 = arith.constant 0 : index
    %83 = vector.load %arg1[%c7, %c0_40, %c0_41] : memref<8x8x128xf32, #tpu.memory_space<vmem>>, vector<1x8x128xf32>
    %84 = vector.shape_cast %83 : vector<1x8x128xf32> to vector<8x128xf32>
    %85 = tpu.concatenate %84, %78 in 1 : vector<8x128xf32>, vector<8x128xf32> -> vector<8x256xf32>
    %cst_42 = arith.constant dense<0.000000e+00> : vector<8x128xf32>
    %86 = tpu.matmul %85, %3, %cst_42 {dimension_numbers = #tpu.dot_dimension_numbers<[1], [0], [0], [1], [0, 0, 1, 1], [], []>} : vector<8x256xf32>, vector<256x128xf32>, vector<8x128xf32> -> vector<8x128xf32>
    %87 = arith.addf %86, %7 : vector<8x128xf32>
    %88 = math.tanh %87 : vector<8x128xf32>
    %89 = tpu.concatenate %88, %82 in 1 : vector<8x128xf32>, vector<8x128xf32> -> vector<8x256xf32>
    %cst_43 = arith.constant dense<0.000000e+00> : vector<8x128xf32>
    %90 = tpu.matmul %89, %4, %cst_43 {dimension_numbers = #tpu.dot_dimension_numbers<[1], [0], [0], [1], [0, 0, 1, 1], [], []>} : vector<8x256xf32>, vector<256x128xf32>, vector<8x128xf32> -> vector<8x128xf32>
    %91 = arith.addf %90, %10 : vector<8x128xf32>
    %92 = math.tanh %91 : vector<8x128xf32>
    %c0_44 = arith.constant 0 : index
    %c0_45 = arith.constant 0 : index
    %93 = vector.load %arg9[%c0_44, %c0_45] : memref<8x128xf32, #tpu.memory_space<vmem>>, vector<8x128xf32>
    tpu.vector_store %arg9[%c0_44, %c0_45], %88 {strides = array<i32>} : memref<8x128xf32, #tpu.memory_space<vmem>>, vector<8x128xf32>,
    %c0_46 = arith.constant 0 : index
    %c0_47 = arith.constant 0 : index
    %94 = vector.load %arg10[%c0_46, %c0_47] : memref<8x128xf32, #tpu.memory_space<vmem>>, vector<8x128xf32>
    tpu.vector_store %arg10[%c0_46, %c0_47], %92 {strides = array<i32>} : memref<8x128xf32, #tpu.memory_space<vmem>>, vector<8x128xf32>,
    %c0_i32_48 = arith.constant 0 : i32
    %95 = arith.cmpi eq, %arg0, %c0_i32_48 : i32
    %96 = arith.extui %95 : i1 to i32
    %c0_i32_49 = arith.constant 0 : i32
    %97 = arith.cmpi ne, %96, %c0_i32_49 : i32
    scf.if %97 {
      %c0_50 = arith.constant 0 : index
      %c0_51 = arith.constant 0 : index
      %98 = vector.load %arg6[%c0_50, %c0_51] : memref<128x128xf32, #tpu.memory_space<vmem>>, vector<128x128xf32>
      %cst_52 = arith.constant dense<0.000000e+00> : vector<8x128xf32>
      %99 = tpu.matmul %92, %98, %cst_52 {dimension_numbers = #tpu.dot_dimension_numbers<[1], [0], [0], [1], [0, 0, 1, 1], [], []>} : vector<8x128xf32>, vector<128x128xf32>, vector<8x128xf32> -> vector<8x128xf32>
      %c0_53 = arith.constant 0 : index
      %c0_54 = arith.constant 0 : index
      %100 = vector.load %arg7[%c0_53, %c0_54] : memref<1x128xf32, #tpu.memory_space<vmem>>, vector<1x128xf32>
      %101 = vector.broadcast %100 : vector<1x128xf32> to vector<8x128xf32>
      %102 = arith.addf %99, %101 : vector<8x128xf32>
      %c0_55 = arith.constant 0 : index
      %c0_56 = arith.constant 0 : index
      %103 = vector.load %arg8[%c0_55, %c0_56] : memref<8x128xf32, #tpu.memory_space<vmem>>, vector<8x128xf32>
      tpu.vector_store %arg8[%c0_55, %c0_56], %102 {strides = array<i32>} : memref<8x128xf32, #tpu.memory_space<vmem>>, vector<8x128xf32>,
    } else {
    }
    return
  }
  func.func @transform_0(%arg0: i32) -> (i32, i32, i32) {
    %c0_i32 = arith.constant 0 : i32
    %c0_i32_0 = arith.constant 0 : i32
    %c0_i32_1 = arith.constant 0 : i32
    return %arg0, %c0_i32, %c0_i32_0 : i32, i32, i32
  }
  func.func @transform_1(%arg0: i32) -> (i32, i32) {
    %c0_i32 = arith.constant 0 : i32
    %c0_i32_0 = arith.constant 0 : i32
    %c0_i32_1 = arith.constant 0 : i32
    return %c0_i32, %c0_i32_0 : i32, i32
  }
  func.func @transform_2(%arg0: i32) -> (i32, i32) {
    %c0_i32 = arith.constant 0 : i32
    %c0_i32_0 = arith.constant 0 : i32
    %c0_i32_1 = arith.constant 0 : i32
    return %c0_i32, %c0_i32_0 : i32, i32
  }
  func.func @transform_3(%arg0: i32) -> (i32, i32) {
    %c0_i32 = arith.constant 0 : i32
    %c0_i32_0 = arith.constant 0 : i32
    %c0_i32_1 = arith.constant 0 : i32
    return %c0_i32, %c0_i32_0 : i32, i32
  }
  func.func @transform_4(%arg0: i32) -> (i32, i32) {
    %c0_i32 = arith.constant 0 : i32
    %c0_i32_0 = arith.constant 0 : i32
    %c0_i32_1 = arith.constant 0 : i32
    return %c0_i32, %c0_i32_0 : i32, i32
  }
  func.func @transform_5(%arg0: i32) -> (i32, i32) {
    %c0_i32 = arith.constant 0 : i32
    %c0_i32_0 = arith.constant 0 : i32
    %c0_i32_1 = arith.constant 0 : i32
    return %c0_i32, %c0_i32_0 : i32, i32
  }
  func.func @transform_6(%arg0: i32) -> (i32, i32) {
    %c0_i32 = arith.constant 0 : i32
    %c0_i32_0 = arith.constant 0 : i32
    %c0_i32_1 = arith.constant 0 : i32
    return %c0_i32, %c0_i32_0 : i32, i32
  }
  func.func @transform_7(%arg0: i32) -> (i32, i32) {
    %c0_i32 = arith.constant 0 : i32
    %c0_i32_0 = arith.constant 0 : i32
    %c0_i32_1 = arith.constant 0 : i32
    return %c0_i32, %c0_i32_0 : i32, i32
  }
}

</mosaic_0001>

<bundles_post_ra>
// kernel: tpu_custom_call.1
= control target key start
LH: loop header
LB: loop body
LE: loop exit
PB: predicated region body
PF: predicated region fallthrough
CT: control target
= control target key end

     0   :  { %12 = vsyncpa [#allocation5], 0  ;;  %s3002_s0 = inlined_call_operand.hbm [shape: f32[8,8,128], index: 0, kind: input, shape index: {}]   ;;  %s3003_s1 = inlined_call_operand.hbm [shape: f32[256,128], index: 1, kind: input, shape index: {}]   ;;  %s3004_s2 = inlined_call_operand.vmem [shape: f32[1,128], index: 2, kind: input, shape index: {}]   ;;  %s3005_s3 = inlined_call_operand.hbm [shape: f32[256,128], index: 3, kind: input, shape index: {}]   ;;  %s3006_s4 = inlined_call_operand.vmem [shape: f32[1,128], index: 4, kind: input, shape index: {}]   ;;  %s3007_s5 = inlined_call_operand.hbm [shape: f32[128,128], index: 5, kind: input, shape index: {}]   ;;  %s3008_s6 = inlined_call_operand.vmem [shape: f32[1,128], index: 6, kind: input, shape index: {}]   ;;  %s3009_s7 = inlined_call_operand.hbm [shape: f32[8,128], index: 7, kind: output, shape index: {}]  }
   0x1   :  { %13 = vsyncpa [#allocation8], 0 }
   0x2   :  { %14 = vsyncpa [#allocation11], 0 }
   0x3   :  { %15 = vsyncpa [#allocation6], 0  ;;  %s2265_s24 = smov [#allocation7]   ;;  %s2266_s26 = smov [#allocation4]  }
   0x4   :  { %s33_s25 = sshll.u32 %s2265_s24, 4  ;;  %s21_s27 = sshll.u32 %s2266_s26, 4  ;;  %s34_s25 = int_to_ptr.vmem [resolvable:$true] %s33_s25  ;;  %s22_s27 = int_to_ptr.vmem [resolvable:$true] %s21_s27 }
   0x5   :  { %s2165_s28 = scalar_lea.vmem %s34_s25, 4096  ;;  %p2170_p1 = scmp.lt.s32.totalorder %s34_s25, %s34_s25 }
   0x6   :  { %p2166_p0 = scmp.ne.s32.totalorder %s34_s25, %s2165_s28  ;;  %p2171_p2 = scmp.lt.s32.totalorder %s2165_s28, %s2165_s28 }
   0x8   :  { %p2172_p3 = por %p2171_p2, %p2170_p1 }
   0xa   :  { %p2173_p4 = pnand %p2172_p3, %p2166_p0 }
   0xc   :  { %2176 = shalt.err (!%p2173_p4)
}
   0xd   :  { %s2267_s29 = smov 128   ;;  %s2268_s30 = smov 8  }
   0xe   :  { %39 = dma.hbm_to_vmem [thread:$0]  %s3003_s1, 4096, %s34_s25, [#allocation8], %s2267_s29, %s2267_s29, %s2268_s30  }
   0xf   :  { %s2185_s10 = scalar_lea.vmem %s22_s27, 1024  ;;  %p2190_p6 = scmp.lt.s32.totalorder %s22_s27, %s22_s27 }
  0x10   :  { %p2186_p5 = scmp.ne.s32.totalorder %s22_s27, %s2185_s10  ;;  %p2191_p7 = scmp.lt.s32.totalorder %s2185_s10, %s2185_s10 }
  0x12   :  { %p2192_p8 = por %p2191_p7, %p2190_p6 }
  0x14   :  { %p2193_p9 = pnand %p2192_p8, %p2186_p5 }
  0x16   :  { %2196 = shalt.err (!%p2193_p9)
}
  0x17   :  { %27 = dma.hbm_to_vmem [thread:$0]  %s3002_s0, 1024, %s22_s27, [#allocation5], %s2267_s29, %s2267_s29, %s2268_s30  }
  0x18   :  { %s2269_s13 = smov [#allocation9]   ;;  %s2270_s15 = smov [#allocation10]  }
  0x19   :  { %s47_s14 = sshll.u32 %s2269_s13, 4  ;;  %s61_s16 = sshll.u32 %s2270_s15, 4  ;;  %s48_s14 = int_to_ptr.vmem [resolvable:$true] %s47_s14  ;;  %s62_s16 = int_to_ptr.vmem [resolvable:$true] %s61_s16 }
  0x1a   :  { %s2205_s1 = scalar_lea.vmem %s48_s14, 4096  ;;  %p2210_p11 = scmp.lt.s32.totalorder %s48_s14, %s48_s14 }
  0x1b   :  { %p2206_p10 = scmp.ne.s32.totalorder %s48_s14, %s2205_s1  ;;  %p2211_p12 = scmp.lt.s32.totalorder %s2205_s1, %s2205_s1 }
  0x1d   :  { %p2212_p13 = por %p2211_p12, %p2210_p11 }
  0x1f   :  { %p2213_p0 = pnand %p2212_p13, %p2206_p10 }
  0x21   :  { %2216 = shalt.err (!%p2213_p0)
}
  0x22   :  { %53 = dma.hbm_to_vmem [thread:$0]  %s3005_s3, 4096, %s48_s14, [#allocation8], %s2267_s29, %s2267_s29, %s2268_s30  }
  0x23   :  { %s2225_s0 = scalar_lea.vmem %s62_s16, 2048  ;;  %p2230_p2 = scmp.lt.s32.totalorder %s62_s16, %s62_s16 }
  0x24   :  { %p2226_p1 = scmp.ne.s32.totalorder %s62_s16, %s2225_s0  ;;  %p2231_p3 = scmp.lt.s32.totalorder %s2225_s0, %s2225_s0 }
  0x26   :  { %p2232_p4 = por %p2231_p3, %p2230_p2 }
  0x28   :  { %p2233_p5 = pnand %p2232_p4, %p2226_p1 }
  0x2a   :  { %2236 = shalt.err (!%p2233_p5)
}
  0x2b   :  { %67 = dma.hbm_to_vmem [thread:$0]  %s3007_s5, 2048, %s62_s16, [#allocation11], %s2267_s29, %s2267_s29, %s2268_s30  }
  0x2c   :  { %2257 = dma.done.wait [#allocation5], 1024  }
  0x2d   :  { %2258 = vsyncadd [#allocation5], 4294966272 }
  0x2e   :  { %2259 = dma.done.wait [#allocation8], 8192  }
  0x2f   :  { %2260 = vsyncadd [#allocation8], 4294959104 }
  0x30   :  { %2261 = dma.done.wait [#allocation11], 2048  }
  0x31   :  { %2262 = vsyncadd [#allocation11], 4294965248  ;;  %v3010_v0 = vmov 0.0   ;;  %v2340_v1 = vld [vmem:[#allocation7 + $0xf8] sm:$0xff]  ;;  %v2344_v3 = vld [vmem:[#allocation7 + $0xf0] sm:$0xff]  ;;  %vm2272_vm0 = vmmov 0  }
  0x32   :  { %233 = vmatprep.mubr.f32.mxu0 %v3010_v0  ;;  %304 = vmatprep.mubr.f32.mxu1 %v3010_v0  ;;  %3044 = vst [vmem:[#allocation17_spill] sm:$0xff] %v2340_v1  ;;  %v2342_v2 = vld [vmem:[#allocation7 + $0x78] sm:$0xff]  ;;  %v2347_v4 = vld [vmem:[#allocation7 + $0x70] sm:$0xff]  ;;  %v2350_v5 = vld [vmem:[#allocation7 + $0xe8] sm:$0xff]  ;;  %s2273_s28 = smov [#allocation12]  }
  0x33   :  { %1438 = vmatprep.subr.mxu0 %v2340_v1  ;;  %v2353_v6 = vld [vmem:[#allocation7 + $0x68] sm:$0xff]  ;;  %v2356_v7 = vld [vmem:[#allocation7 + $0xe0] sm:$0xff]  ;;  %v2362_v9 = vld [vmem:[#allocation7 + $0xd8] sm:$0xff]  ;;  %s1424_s29 = sshll.u32 %s2273_s28, 4  ;;  %s1425_s29 = int_to_ptr.vmem [resolvable:$true] %s1424_s29 }
  0x34   :  { %1439 = vmatpush3.msra.mxu0 %v2342_v2  ;;  %v2359_v8 = vld [vmem:[#allocation7 + $0x60] sm:$0xff]  ;;  %v2365_v10 = vld [vmem:[#allocation7 + $0x58] sm:$0xff]  ;;  %v2368_v11 = vld [vmem:[#allocation7 + $0xd0] sm:$0xff]  ;;  %s2237_s30 = scalar_lea.vmem %s1425_s29, 128  ;;  %p2242_p7 = scmp.lt.s32.totalorder %s1425_s29, %s1425_s29 }
  0x35   :  { %1440 = vmatprep.subr.mxu0 %v2344_v3  ;;  %v2371_v12 = vld [vmem:[#allocation7 + $0x50] sm:$0xff]  ;;  %v2374_v13 = vld [vmem:[#allocation7 + $0xc8] sm:$0xff]  ;;  %v2379_v15 = vld [vmem:[#allocation9 + $0xf8] sm:$0xff]  ;;  %p2238_p6 = scmp.ne.s32.totalorder %s1425_s29, %s2237_s30  ;;  %p2243_p8 = scmp.lt.s32.totalorder %s2237_s30, %s2237_s30 }
  0x36   :  { %1441 = vmatpush3.msra.mxu0 %v2347_v4  ;;  %v2376_v14 = vld [vmem:[#allocation7 + $0x48] sm:$0xff]  ;;  %3045 = vst [vmem:[#allocation18_spill] sm:$0xff] %v2379_v15  ;;  %v2381_v16 = vld [vmem:[#allocation9 + $0x78] sm:$0xff]  ;;  %v2383_v17 = vld [vmem:[#allocation9 + $0xf0] sm:$0xff]  ;;  %1473 = vmatprep.subr.mxu1 %v2379_v15 }
  0x37   :  { %1442 = vmatprep.subr.mxu0 %v2350_v5  ;;  %v2386_v18 = vld [vmem:[#allocation7 + $0xc0] sm:$0xff]  ;;  %v2389_v19 = vld [vmem:[#allocation9 + $0x70] sm:$0xff]  ;;  %1474 = vmatpush3.msra.mxu1 %v2381_v16  ;;  %v2395_v21 = vld [vmem:[#allocation9 + $0xe8] sm:$0xff]  ;;  %p2244_p9 = por %p2243_p8, %p2242_p7 }
  0x38   :  { %1443 = vmatpush3.msra.mxu0 %v2353_v6  ;;  %v2392_v20 = vld [vmem:[#allocation7 + $0x40] sm:$0xff]  ;;  %v2398_v22 = vld [vmem:[#allocation7 + $0xb8] sm:$0xff]  ;;  %1475 = vmatprep.subr.mxu1 %v2383_v17  ;;  %v2401_v23 = vld [vmem:[#allocation9 + $0x68] sm:$0xff] }
  0x39   :  { %1444 = vmatprep.subr.mxu0 %v2356_v7  ;;  %v2404_v24 = vld [vmem:[#allocation7 + $0x38] sm:$0xff]  ;;  %1476 = vmatpush3.msra.mxu1 %v2389_v19  ;;  %v2407_v25 = vld [vmem:[#allocation9 + $0xe0] sm:$0xff]  ;;  %v2410_v26 = vld [vmem:[#allocation7 + $0xb0] sm:$0xff]  ;;  %p2245_p10 = pnand %p2244_p9, %p2238_p6 }
  0x3a   :  { %1445 = vmatpush3.msra.mxu0 %v2359_v8  ;;  %1477 = vmatprep.subr.mxu1 %v2395_v21  ;;  %v2413_v27 = vld [vmem:[#allocation9 + $0x60] sm:$0xff]  ;;  %v2416_v28 = vld [vmem:[#allocation7 + $0x30] sm:$0xff]  ;;  %v2419_v29 = vld [vmem:[#allocation9 + $0xd8] sm:$0xff] }
  0x3b   :  { %1446 = vmatprep.subr.mxu0 %v2362_v9  ;;  %1478 = vmatpush3.msra.mxu1 %v2401_v23  ;;  %v2422_v30 = vld [vmem:[#allocation7 + $0xa8] sm:$0xff]  ;;  %v2425_v31 = vld [vmem:[#allocation9 + $0x58] sm:$0xff]  ;;  %v2431_v33 = vld [vmem:[#allocation9 + $0xd0] sm:$0xff] }
  0x3c   :  { %1447 = vmatpush3.msra.mxu0 %v2365_v10  ;;  %1479 = vmatprep.subr.mxu1 %v2407_v25  ;;  %v2428_v32 = vld [vmem:[#allocation7 + $0x28] sm:$0xff]  ;;  %v2434_v34 = vld [vmem:[#allocation7 + $0xa0] sm:$0xff]  ;;  %v2442_v36 = vld [vmem:[#allocation7 + $0x98] sm:$0xff] }
  0x3d   :  { %1448 = vmatprep.subr.mxu0 %v2368_v11  ;;  %1480 = vmatpush3.msra.mxu1 %v2413_v27  ;;  %v2438_v35 = vld [vmem:[#allocation7 + $0x20] sm:$0xff]  ;;  %3046 = vst [vmem:[#allocation19_spill] sm:$0xff] %v2442_v36  ;;  %v2446_v37 = vld [vmem:[#allocation7 + $0x18] sm:$0xff]  ;;  %v2449_v38 = vld [vmem:[#allocation7 + $0x90] sm:$0xff] }
  0x3e   :  { %1449 = vmatpush3.msra.mxu0 %v2371_v12  ;;  %1481 = vmatprep.subr.mxu1 %v2419_v29  ;;  %3047 = vst [vmem:[#allocation20_spill] sm:$0xff] %v2446_v37  ;;  %3048 = vst [vmem:[#allocation21_spill] sm:$0xff] %v2449_v38  ;;  %v2452_v39 = vld [vmem:[#allocation7 + $0x10] sm:$0xff]  ;;  %v2455_v40 = vld [vmem:[#allocation7 + $0x88] sm:$0xff] }
  0x3f   :  { %1450 = vmatprep.subr.mxu0 %v2374_v13  ;;  %1482 = vmatpush3.msra.mxu1 %v2425_v31  ;;  %3049 = vst [vmem:[#allocation22_spill] sm:$0xff] %v2452_v39  ;;  %3050 = vst [vmem:[#allocation23_spill] sm:$0xff] %v2455_v40  ;;  %v2458_v41 = vld [vmem:[#allocation7 + $0x8] sm:$0xff]  ;;  %v2461_v42 = vld [vmem:[#allocation7 + $0x80] sm:$0xff] }
  0x40   :  { %1451 = vmatpush3.msra.mxu0 %v2376_v14  ;;  %1483 = vmatprep.subr.mxu1 %v2431_v33  ;;  %3051 = vst [vmem:[#allocation24_spill] sm:$0xff] %v2458_v41  ;;  %3052 = vst [vmem:[#allocation25_spill] sm:$0xff] %v2461_v42  ;;  %v2464_v43 = vld [vmem:[#allocation7] sm:$0xff]  ;;  %v2502_v45 = vld [vmem:[#allocation9 + $0x50] sm:$0xff] }
  0x41   :  { %1452 = vmatprep.subr.mxu0 %v2386_v18  ;;  %3053 = vst [vmem:[#allocation26_spill] sm:$0xff] %v2464_v43  ;;  %v168_v44 = vld [vmem:[#allocation4] sm:$0xff]  ;;  %1484 = vmatpush3.msra.mxu1 %v2502_v45  ;;  %v2505_v46 = vld [vmem:[#allocation9 + $0xc8] sm:$0xff]  ;;  %v2517_v50 = vld [vmem:[#allocation9 + $0xb8] sm:$0xff] }
  0x42   :  { %1453 = vmatpush3.msra.mxu0 %v2392_v20  ;;  %1485 = vmatprep.subr.mxu1 %v2505_v46  ;;  %v2508_v47 = vld [vmem:[#allocation9 + $0x48] sm:$0xff]  ;;  %v2511_v48 = vld [vmem:[#allocation9 + $0xc0] sm:$0xff]  ;;  %v2520_v51 = vld [vmem:[#allocation9 + $0x38] sm:$0xff] }
  0x43   :  { %1454 = vmatprep.subr.mxu0 %v2398_v22  ;;  %1486 = vmatpush3.msra.mxu1 %v2508_v47  ;;  %v2514_v49 = vld [vmem:[#allocation9 + $0x40] sm:$0xff]  ;;  %v2523_v52 = vld [vmem:[#allocation9 + $0xb0] sm:$0xff]  ;;  %v2528_v54 = vld [vmem:[#allocation9 + $0xa8] sm:$0xff] }
  0x44   :  { %1455 = vmatpush3.msra.mxu0 %v2404_v24  ;;  %1487 = vmatprep.subr.mxu1 %v2511_v48  ;;  %v2526_v53 = vld [vmem:[#allocation9 + $0x30] sm:$0xff]  ;;  %v2530_v55 = vld [vmem:[#allocation9 + $0x28] sm:$0xff]  ;;  %v2533_v56 = vld [vmem:[#allocation9 + $0xa0] sm:$0xff] }
  0x45   :  { %1456 = vmatprep.subr.mxu0 %v2410_v26  ;;  %1488 = vmatpush3.msra.mxu1 %v2514_v49  ;;  %v2536_v57 = vld [vmem:[#allocation9 + $0x20] sm:$0xff]  ;;  %v2539_v58 = vld [vmem:[#allocation9 + $0x98] sm:$0xff]  ;;  %v2545_v60 = vld [vmem:[#allocation9 + $0x90] sm:$0xff] }
  0x46   :  { %1457 = vmatpush3.msra.mxu0 %v2416_v28  ;;  %1489 = vmatprep.subr.mxu1 %v2517_v50  ;;  %v2542_v59 = vld [vmem:[#allocation9 + $0x18] sm:$0xff]  ;;  %3054 = vst [vmem:[#allocation27_spill] sm:$0xff] %v2545_v60  ;;  %v2548_v61 = vld [vmem:[#allocation9 + $0x10] sm:$0xff]  ;;  %v2551_v62 = vld [vmem:[#allocation9 + $0x88] sm:$0xff] }
  0x47   :  { %1458 = vmatprep.subr.mxu0 %v2422_v30  ;;  %1490 = vmatpush3.msra.mxu1 %v2520_v51  ;;  %3055 = vst [vmem:[#allocation28_spill] sm:$0xff] %v2548_v61  ;;  %3056 = vst [vmem:[#allocation29_spill] sm:$0xff] %v2551_v62  ;;  %v2554_v63 = vld [vmem:[#allocation9 + $0x8] sm:$0xff]  ;;  %v2560_v0 = vld [vmem:[#allocation9] sm:$0xff] }
  0x48   :  { %1459 = vmatpush3.msra.mxu0 %v2428_v32  ;;  %1491 = vmatprep.subr.mxu1 %v2523_v52  ;;  %3057 = vst [vmem:[#allocation30_spill] sm:$0xff] %v2554_v63  ;;  %3059 = vst [vmem:[#allocation32_spill] sm:$0xff] %v2560_v0 }
  0x49   :  { %1460 = vmatprep.subr.mxu0 %v2434_v34  ;;  %1492 = vmatpush3.msra.mxu1 %v2526_v53 }
  0x4a   :  { %1461 = vmatpush3.msra.mxu0 %v2438_v35  ;;  %1493 = vmatprep.subr.mxu1 %v2528_v54 }
  0x4b   :  { %1462 = vmatprep.subr.mxu0 %v2442_v36  ;;  %1494 = vmatpush3.msra.mxu1 %v2530_v55 }
  0x4c   :  { %1463 = vmatpush3.msra.mxu0 %v2446_v37  ;;  %1495 = vmatprep.subr.mxu1 %v2533_v56 }
  0x4d   :  { %1464 = vmatprep.subr.mxu0 %v2449_v38  ;;  %1496 = vmatpush3.msra.mxu1 %v2536_v57 }
  0x4e   :  { %1465 = vmatpush3.msra.mxu0 %v2452_v39  ;;  %1497 = vmatprep.subr.mxu1 %v2539_v58 }
  0x4f   :  { %1466 = vmatprep.subr.mxu0 %v2455_v40  ;;  %1498 = vmatpush3.msra.mxu1 %v2542_v59 }
  0x50   :  { %1467 = vmatpush3.msra.mxu0 %v2458_v41  ;;  %1499 = vmatprep.subr.mxu1 %v2545_v60 }
  0x51   :  { %1468 = vmatprep.subr.mxu0 %v2461_v42  ;;  %1500 = vmatpush3.msra.mxu1 %v2548_v61 }
  0x52   :  { %1469 = vmatpush3.msra.mxu0 %v2464_v43  ;;  %1501 = vmatprep.subr.mxu1 %v2551_v62 }
  0x53   :  { %234 = vmatmul.mubr.f32.vlgmr.msra.gmra.mxu0 %v168_v44  ;;  %1508 = vmatprep.subr.mxu0 %v2340_v1  ;;  %v2557_v44 = vld [vmem:[#allocation9 + $0x80] sm:$0xff] }
  0x54   :  { %1509 = vmatpush3.msra.mxu0 %v2342_v2  ;;  %3058 = vst [vmem:[#allocation31_spill] sm:$0xff] %v2557_v44  ;;  %1502 = vmatpush3.msra.mxu1 %v2554_v63 }
  0x55   :  { %1510 = vmatprep.subr.mxu0 %v2344_v3  ;;  %1503 = vmatprep.subr.mxu1 %v2557_v44 }
  0x56   :  { %1511 = vmatpush3.msra.mxu0 %v2347_v4  ;;  %1504 = vmatpush3.msra.mxu1 %v2560_v0 }
  0x57   :  { %1512 = vmatprep.subr.mxu0 %v2350_v5  ;;  %1543 = vmatprep.subr.mxu1 %v2379_v15 }
  0x58   :  { %1513 = vmatpush3.msra.mxu0 %v2353_v6 }
  0x59   :  { %1514 = vmatprep.subr.mxu0 %v2356_v7 }
  0x5a   :  { %1515 = vmatpush3.msra.mxu0 %v2359_v8 }
  0x5b   :  { %1516 = vmatprep.subr.mxu0 %v2362_v9 }
  0x5c   :  { %1517 = vmatpush3.msra.mxu0 %v2365_v10 }
  0x5d   :  { %1518 = vmatprep.subr.mxu0 %v2368_v11 }
  0x5e   :  { %1519 = vmatpush3.msra.mxu0 %v2371_v12 }
  0x5f   :  { %1520 = vmatprep.subr.mxu0 %v2374_v13 }
  0x60   :  { %1521 = vmatpush3.msra.mxu0 %v2376_v14 }
  0x61   :  { %1522 = vmatprep.subr.mxu0 %v2386_v18 }
  0x62   :  { %1523 = vmatpush3.msra.mxu0 %v2392_v20 }
  0x63   :  { %1524 = vmatprep.subr.mxu0 %v2398_v22 }
  0x64   :  { %1525 = vmatpush3.msra.mxu0 %v2404_v24 }
  0x65   :  { %1526 = vmatprep.subr.mxu0 %v2410_v26 }
  0x66   :  { %1527 = vmatpush3.msra.mxu0 %v2416_v28 }
  0x67   :  { %1528 = vmatprep.subr.mxu0 %v2422_v30 }
  0x68   :  { %1529 = vmatpush3.msra.mxu0 %v2428_v32 }
  0x69   :  { %1530 = vmatprep.subr.mxu0 %v2434_v34 }
  0x6a   :  { %1531 = vmatpush3.msra.mxu0 %v2438_v35 }
  0x6b   :  { %1532 = vmatprep.subr.mxu0 %v2442_v36 }
  0x6c   :  { %1533 = vmatpush3.msra.mxu0 %v2446_v37 }
  0x6d   :  { %1534 = vmatprep.subr.mxu0 %v2449_v38 }
  0x6e   :  { %1535 = vmatpush3.msra.mxu0 %v2452_v39  ;;  %v312_v39 = vld [vmem:[#allocation4 + $0x8] sm:$0xff] }
  0x6f   :  { %1536 = vmatprep.subr.mxu0 %v2455_v40 }
  0x70   :  { %1537 = vmatpush3.msra.mxu0 %v2458_v41 }
  0x71   :  { %1538 = vmatprep.subr.mxu0 %v2461_v42 }
  0x72   :  { %1539 = vmatpush3.msra.mxu0 %v2464_v43  ;;  %v2569_v43 = vld [vmem:[%s3004_s2] ss:$0 sm:$0xff] }
  0x73   :  { %1578 = vmatprep.subr.mxu0 %v2340_v1 }
 0x113   :  { %v1470_v1 = vpop.f32.mrf.mxu0 }
 0x115   :  { %v1471_v42 = vpop.f32.mrf.mxu0 }
 0x116   :  { %v1472_v41 = vadd.f32 %v1471_v42, %v1470_v1  ;;  %v3060_v1 = vld [vmem:[#allocation29_spill] sm:$0xff] }
 0x117   :  { %v3064_v42 = vld [vmem:[#allocation25_spill] sm:$0xff] }
 0x118   :  { %v236_v40 = vadd.f32 %v1472_v41, %v2569_v43  ;;  %v3063_v41 = vld [vmem:[#allocation24_spill] sm:$0xff] }
 0x11a   :  { %2059 = vtanh.f32 %v236_v40  ;;  %v3062_v40 = vld [vmem:[#allocation23_spill] sm:$0xff] }
 0x127   :  { %v2060_v62 = vpop.eup %2059 }
 0x128   :  { %305 = vmatmul.mubr.f32.vlgmr.msra.gmra.mxu1 %v2060_v62  ;;  %377 = vmatprep.mubr.f32.mxu0 %v2060_v62  ;;  %v3065_v62 = vld [vmem:[#allocation26_spill] sm:$0xff] }
 0x129   :  { %378 = vmatmul.mubr.f32.vlgmr.msra.gmra.mxu0 %v312_v39  ;;  %1544 = vmatpush3.msra.mxu1 %v2381_v16  ;;  %v3061_v39 = vld [vmem:[#allocation22_spill] sm:$0xff] }
 0x12a   :  { %1545 = vmatprep.subr.mxu1 %v2383_v17  ;;  %1579 = vmatpush3.msra.mxu0 %v2342_v2 }
 0x12b   :  { %1546 = vmatpush3.msra.mxu1 %v2389_v19  ;;  %1580 = vmatprep.subr.mxu0 %v2344_v3 }
 0x12c   :  { %1547 = vmatprep.subr.mxu1 %v2395_v21  ;;  %1581 = vmatpush3.msra.mxu0 %v2347_v4 }
 0x12d   :  { %1548 = vmatpush3.msra.mxu1 %v2401_v23  ;;  %1582 = vmatprep.subr.mxu0 %v2350_v5 }
 0x12e   :  { %1549 = vmatprep.subr.mxu1 %v2407_v25  ;;  %1583 = vmatpush3.msra.mxu0 %v2353_v6 }
 0x12f   :  { %1550 = vmatpush3.msra.mxu1 %v2413_v27  ;;  %1584 = vmatprep.subr.mxu0 %v2356_v7 }
 0x130   :  { %1551 = vmatprep.subr.mxu1 %v2419_v29  ;;  %1585 = vmatpush3.msra.mxu0 %v2359_v8 }
 0x131   :  { %1552 = vmatpush3.msra.mxu1 %v2425_v31  ;;  %1586 = vmatprep.subr.mxu0 %v2362_v9 }
 0x132   :  { %1553 = vmatprep.subr.mxu1 %v2431_v33  ;;  %1587 = vmatpush3.msra.mxu0 %v2365_v10 }
 0x133   :  { %1554 = vmatpush3.msra.mxu1 %v2502_v45  ;;  %1588 = vmatprep.subr.mxu0 %v2368_v11 }
 0x134   :  { %1555 = vmatprep.subr.mxu1 %v2505_v46  ;;  %1589 = vmatpush3.msra.mxu0 %v2371_v12 }
 0x135   :  { %1556 = vmatpush3.msra.mxu1 %v2508_v47  ;;  %1590 = vmatprep.subr.mxu0 %v2374_v13 }
 0x136   :  { %1557 = vmatprep.subr.mxu1 %v2511_v48  ;;  %1591 = vmatpush3.msra.mxu0 %v2376_v14 }
 0x137   :  { %1558 = vmatpush3.msra.mxu1 %v2514_v49  ;;  %1592 = vmatprep.subr.mxu0 %v2386_v18 }
 0x138   :  { %1559 = vmatprep.subr.mxu1 %v2517_v50  ;;  %1593 = vmatpush3.msra.mxu0 %v2392_v20 }
 0x139   :  { %1560 = vmatpush3.msra.mxu1 %v2520_v51  ;;  %1594 = vmatprep.subr.mxu0 %v2398_v22 }
 0x13a   :  { %1561 = vmatprep.subr.mxu1 %v2523_v52  ;;  %1595 = vmatpush3.msra.mxu0 %v2404_v24 }
 0x13b   :  { %1562 = vmatpush3.msra.mxu1 %v2526_v53  ;;  %1596 = vmatprep.subr.mxu0 %v2410_v26 }
 0x13c   :  { %1563 = vmatprep.subr.mxu1 %v2528_v54  ;;  %1597 = vmatpush3.msra.mxu0 %v2416_v28 }
 0x13d   :  { %1564 = vmatpush3.msra.mxu1 %v2530_v55  ;;  %1598 = vmatprep.subr.mxu0 %v2422_v30 }
 0x13e   :  { %1565 = vmatprep.subr.mxu1 %v2533_v56  ;;  %1599 = vmatpush3.msra.mxu0 %v2428_v32 }
 0x13f   :  { %1566 = vmatpush3.msra.mxu1 %v2536_v57  ;;  %1600 = vmatprep.subr.mxu0 %v2434_v34 }
 0x140   :  { %1567 = vmatprep.subr.mxu1 %v2539_v58  ;;  %1601 = vmatpush3.msra.mxu0 %v2438_v35 }
 0x141   :  { %1568 = vmatpush3.msra.mxu1 %v2542_v59  ;;  %1602 = vmatprep.subr.mxu0 %v2442_v36 }
 0x142   :  { %1569 = vmatprep.subr.mxu1 %v2545_v60  ;;  %1603 = vmatpush3.msra.mxu0 %v2446_v37 }
 0x143   :  { %1570 = vmatpush3.msra.mxu1 %v2548_v61  ;;  %1604 = vmatprep.subr.mxu0 %v2449_v38  ;;  %v3066_v38 = vld [vmem:[#allocation17_spill] sm:$0xff] }
 0x144   :  { %1571 = vmatprep.subr.mxu1 %v3060_v1  ;;  %1605 = vmatpush3.msra.mxu0 %v3061_v39 }
 0x145   :  { %1572 = vmatpush3.msra.mxu1 %v2554_v63  ;;  %1606 = vmatprep.subr.mxu0 %v3062_v40  ;;  %v2639_v40 = vld [vmem:[%s3006_s4] ss:$0 sm:$0xff] }
 0x146   :  { %1573 = vmatprep.subr.mxu1 %v2557_v44  ;;  %1607 = vmatpush3.msra.mxu0 %v3063_v41 }
 0x147   :  { %1574 = vmatpush3.msra.mxu1 %v2560_v0  ;;  %1608 = vmatprep.subr.mxu0 %v3064_v42 }
 0x148   :  { %1609 = vmatpush3.msra.mxu0 %v3065_v62  ;;  %1613 = vmatprep.subr.mxu1 %v2379_v15  ;;  %v456_v62 = vld [vmem:[#allocation4 + $0x10] sm:$0xff] }
 0x149   :  { %1648 = vmatprep.subr.mxu0 %v3066_v38 }
 0x1e8   :  { %v1505_v1 = vpop.f32.mrf.mxu1 }
 0x1e9   :  { %v1540_v39 = vpop.f32.mrf.mxu0 }
 0x1ea   :  { %v1506_v44 = vpop.f32.mrf.mxu1 }
 0x1eb   :  { %v1507_v63 = vadd.f32 %v1506_v44, %v1505_v1  ;;  %v1541_v41 = vpop.f32.mrf.mxu0  ;;  %v3072_v44 = vld [vmem:[#allocation23_spill] sm:$0xff] }
 0x1ec   :  { %v1542_v61 = vadd.f32 %v1541_v41, %v1540_v39  ;;  %v3073_v1 = vld [vmem:[#allocation31_spill] sm:$0xff]  ;;  %v3074_v39 = vld [vmem:[#allocation24_spill] sm:$0xff] }
 0x1ed   :  { %v307_v0 = vadd.f32 %v1507_v63, %v2639_v40  ;;  %v3071_v63 = vld [vmem:[#allocation30_spill] sm:$0xff]  ;;  %v3075_v41 = vld [vmem:[#allocation32_spill] sm:$0xff] }
 0x1ee   :  { %v380_v42 = vadd.f32 %v1542_v61, %v2569_v43  ;;  %v3070_v61 = vld [vmem:[#allocation22_spill] sm:$0xff] }
 0x1ef   :  { %2061 = vtanh.f32 %v307_v0  ;;  %v3067_v0 = vld [vmem:[#allocation28_spill] sm:$0xff] }
 0x1f0   :  { %2063 = vtanh.f32 %v380_v42  ;;  %v3076_v42 = vld [vmem:[#allocation25_spill] sm:$0xff] }
 0x1fc   :  { %v2062_v15 = vpop.eup %2061 }
 0x1fd   :  { %v2064_v38 = vpop.eup %2063  ;;  %448 = vmatprep.mubr.f32.mxu1 %v2062_v15  ;;  %v3068_v15 = vld [vmem:[#allocation21_spill] sm:$0xff] }
 0x1fe   :  { %449 = vmatmul.mubr.f32.vlgmr.msra.gmra.mxu1 %v2064_v38  ;;  %521 = vmatprep.mubr.f32.mxu0 %v2064_v38  ;;  %v3069_v38 = vld [vmem:[#allocation29_spill] sm:$0xff] }
 0x1ff   :  { %522 = vmatmul.mubr.f32.vlgmr.msra.gmra.mxu0 %v456_v62  ;;  %1614 = vmatpush3.msra.mxu1 %v2381_v16  ;;  %v3077_v62 = vld [vmem:[#allocation26_spill] sm:$0xff] }
 0x200   :  { %1615 = vmatprep.subr.mxu1 %v2383_v17  ;;  %1649 = vmatpush3.msra.mxu0 %v2342_v2 }
 0x201   :  { %1616 = vmatpush3.msra.mxu1 %v2389_v19  ;;  %1650 = vmatprep.subr.mxu0 %v2344_v3 }
 0x202   :  { %1617 = vmatprep.subr.mxu1 %v2395_v21  ;;  %1651 = vmatpush3.msra.mxu0 %v2347_v4 }
 0x203   :  { %1618 = vmatpush3.msra.mxu1 %v2401_v23  ;;  %1652 = vmatprep.subr.mxu0 %v2350_v5 }
 0x204   :  { %1619 = vmatprep.subr.mxu1 %v2407_v25  ;;  %1653 = vmatpush3.msra.mxu0 %v2353_v6 }
 0x205   :  { %1620 = vmatpush3.msra.mxu1 %v2413_v27  ;;  %1654 = vmatprep.subr.mxu0 %v2356_v7 }
 0x206   :  { %1621 = vmatprep.subr.mxu1 %v2419_v29  ;;  %1655 = vmatpush3.msra.mxu0 %v2359_v8 }
 0x207   :  { %1622 = vmatpush3.msra.mxu1 %v2425_v31  ;;  %1656 = vmatprep.subr.mxu0 %v2362_v9 }
 0x208   :  { %1623 = vmatprep.subr.mxu1 %v2431_v33  ;;  %1657 = vmatpush3.msra.mxu0 %v2365_v10 }
 0x209   :  { %1624 = vmatpush3.msra.mxu1 %v2502_v45  ;;  %1658 = vmatprep.subr.mxu0 %v2368_v11 }
 0x20a   :  { %1625 = vmatprep.subr.mxu1 %v2505_v46  ;;  %1659 = vmatpush3.msra.mxu0 %v2371_v12 }
 0x20b   :  { %1626 = vmatpush3.msra.mxu1 %v2508_v47  ;;  %1660 = vmatprep.subr.mxu0 %v2374_v13 }
 0x20c   :  { %1627 = vmatprep.subr.mxu1 %v2511_v48  ;;  %1661 = vmatpush3.msra.mxu0 %v2376_v14 }
 0x20d   :  { %1628 = vmatpush3.msra.mxu1 %v2514_v49  ;;  %1662 = vmatprep.subr.mxu0 %v2386_v18 }
 0x20e   :  { %1629 = vmatprep.subr.mxu1 %v2517_v50  ;;  %1663 = vmatpush3.msra.mxu0 %v2392_v20 }
 0x20f   :  { %1630 = vmatpush3.msra.mxu1 %v2520_v51  ;;  %1664 = vmatprep.subr.mxu0 %v2398_v22 }
 0x210   :  { %1631 = vmatprep.subr.mxu1 %v2523_v52  ;;  %1665 = vmatpush3.msra.mxu0 %v2404_v24 }
 0x211   :  { %1632 = vmatpush3.msra.mxu1 %v2526_v53  ;;  %1666 = vmatprep.subr.mxu0 %v2410_v26 }
 0x212   :  { %1633 = vmatprep.subr.mxu1 %v2528_v54  ;;  %1667 = vmatpush3.msra.mxu0 %v2416_v28 }
 0x213   :  { %1634 = vmatpush3.msra.mxu1 %v2530_v55  ;;  %1668 = vmatprep.subr.mxu0 %v2422_v30 }
 0x214   :  { %1635 = vmatprep.subr.mxu1 %v2533_v56  ;;  %1669 = vmatpush3.msra.mxu0 %v2428_v32 }
 0x215   :  { %1636 = vmatpush3.msra.mxu1 %v2536_v57  ;;  %1670 = vmatprep.subr.mxu0 %v2434_v34 }
 0x216   :  { %1637 = vmatprep.subr.mxu1 %v2539_v58  ;;  %1671 = vmatpush3.msra.mxu0 %v2438_v35 }
 0x217   :  { %1638 = vmatpush3.msra.mxu1 %v2542_v59  ;;  %1672 = vmatprep.subr.mxu0 %v2442_v36 }
 0x218   :  { %1639 = vmatprep.subr.mxu1 %v2545_v60  ;;  %1673 = vmatpush3.msra.mxu0 %v2446_v37 }
 0x219   :  { %1640 = vmatpush3.msra.mxu1 %v3067_v0  ;;  %1674 = vmatprep.subr.mxu0 %v3068_v15  ;;  %v3078_v0 = vld [vmem:[#allocation18_spill] sm:$0xff]  ;;  %v3079_v15 = vld [vmem:[#allocation17_spill] sm:$0xff] }
 0x21a   :  { %1641 = vmatprep.subr.mxu1 %v3069_v38  ;;  %1675 = vmatpush3.msra.mxu0 %v3070_v61 }
 0x21b   :  { %1642 = vmatpush3.msra.mxu1 %v3071_v63  ;;  %1676 = vmatprep.subr.mxu0 %v3072_v44 }
 0x21c   :  { %1643 = vmatprep.subr.mxu1 %v3073_v1  ;;  %1677 = vmatpush3.msra.mxu0 %v3074_v39 }
 0x21d   :  { %1644 = vmatpush3.msra.mxu1 %v3075_v41  ;;  %1678 = vmatprep.subr.mxu0 %v3076_v42  ;;  %v600_v42 = vld [vmem:[#allocation4 + $0x18] sm:$0xff] }
 0x21e   :  { %1679 = vmatpush3.msra.mxu0 %v3077_v62  ;;  %1683 = vmatprep.subr.mxu1 %v3078_v0 }
 0x21f   :  { %1718 = vmatprep.subr.mxu0 %v3079_v15 }
 0x2be   :  { %v1575_v38 = vpop.f32.mrf.mxu1 }
 0x2bf   :  { %v1610_v61 = vpop.f32.mrf.mxu0 }
 0x2c0   :  { %v1576_v37 = vpop.f32.mrf.mxu1 }
 0x2c1   :  { %v1577_v63 = vadd.f32 %v1576_v37, %v1575_v38  ;;  %v1611_v60 = vpop.f32.mrf.mxu0  ;;  %v3081_v37 = vld [vmem:[#allocation27_spill] sm:$0xff]  ;;  %v3083_v38 = vld [vmem:[#allocation28_spill] sm:$0xff] }
 0x2c2   :  { %v1612_v44 = vadd.f32 %v1611_v60, %v1610_v61  ;;  %v3082_v60 = vld [vmem:[#allocation20_spill] sm:$0xff]  ;;  %v3084_v61 = vld [vmem:[#allocation21_spill] sm:$0xff] }
 0x2c3   :  { %v451_v1 = vadd.f32 %v1577_v63, %v2639_v40  ;;  %v3085_v63 = vld [vmem:[#allocation29_spill] sm:$0xff] }
 0x2c4   :  { %v524_v39 = vadd.f32 %v1612_v44, %v2569_v43  ;;  %v3086_v44 = vld [vmem:[#allocation22_spill] sm:$0xff] }
 0x2c5   :  { %2065 = vtanh.f32 %v451_v1  ;;  %v3087_v1 = vld [vmem:[#allocation30_spill] sm:$0xff] }
 0x2c6   :  { %2067 = vtanh.f32 %v524_v39  ;;  %v3088_v39 = vld [vmem:[#allocation23_spill] sm:$0xff] }
 0x2d2   :  { %v2066_v41 = vpop.eup %2065 }
 0x2d3   :  { %v2068_v36 = vpop.eup %2067  ;;  %592 = vmatprep.mubr.f32.mxu1 %v2066_v41  ;;  %v3089_v41 = vld [vmem:[#allocation31_spill] sm:$0xff] }
 0x2d4   :  { %593 = vmatmul.mubr.f32.vlgmr.msra.gmra.mxu1 %v2068_v36  ;;  %665 = vmatprep.mubr.f32.mxu0 %v2068_v36  ;;  %v3080_v36 = vld [vmem:[#allocation19_spill] sm:$0xff] }
 0x2d5   :  { %666 = vmatmul.mubr.f32.vlgmr.msra.gmra.mxu0 %v600_v42  ;;  %1684 = vmatpush3.msra.mxu1 %v2381_v16  ;;  %v3090_v42 = vld [vmem:[#allocation24_spill] sm:$0xff] }
 0x2d6   :  { %1685 = vmatprep.subr.mxu1 %v2383_v17  ;;  %1719 = vmatpush3.msra.mxu0 %v2342_v2 }
 0x2d7   :  { %1686 = vmatpush3.msra.mxu1 %v2389_v19  ;;  %1720 = vmatprep.subr.mxu0 %v2344_v3 }
 0x2d8   :  { %1687 = vmatprep.subr.mxu1 %v2395_v21  ;;  %1721 = vmatpush3.msra.mxu0 %v2347_v4 }
 0x2d9   :  { %1688 = vmatpush3.msra.mxu1 %v2401_v23  ;;  %1722 = vmatprep.subr.mxu0 %v2350_v5 }
 0x2da   :  { %1689 = vmatprep.subr.mxu1 %v2407_v25  ;;  %1723 = vmatpush3.msra.mxu0 %v2353_v6 }
 0x2db   :  { %1690 = vmatpush3.msra.mxu1 %v2413_v27  ;;  %1724 = vmatprep.subr.mxu0 %v2356_v7 }
 0x2dc   :  { %1691 = vmatprep.subr.mxu1 %v2419_v29  ;;  %1725 = vmatpush3.msra.mxu0 %v2359_v8 }
 0x2dd   :  { %1692 = vmatpush3.msra.mxu1 %v2425_v31  ;;  %1726 = vmatprep.subr.mxu0 %v2362_v9 }
 0x2de   :  { %1693 = vmatprep.subr.mxu1 %v2431_v33  ;;  %1727 = vmatpush3.msra.mxu0 %v2365_v10 }
 0x2df   :  { %1694 = vmatpush3.msra.mxu1 %v2502_v45  ;;  %1728 = vmatprep.subr.mxu0 %v2368_v11 }
 0x2e0   :  { %1695 = vmatprep.subr.mxu1 %v2505_v46  ;;  %1729 = vmatpush3.msra.mxu0 %v2371_v12 }
 0x2e1   :  { %1696 = vmatpush3.msra.mxu1 %v2508_v47  ;;  %1730 = vmatprep.subr.mxu0 %v2374_v13 }
 0x2e2   :  { %1697 = vmatprep.subr.mxu1 %v2511_v48  ;;  %1731 = vmatpush3.msra.mxu0 %v2376_v14 }
 0x2e3   :  { %1698 = vmatpush3.msra.mxu1 %v2514_v49  ;;  %1732 = vmatprep.subr.mxu0 %v2386_v18 }
 0x2e4   :  { %1699 = vmatprep.subr.mxu1 %v2517_v50  ;;  %1733 = vmatpush3.msra.mxu0 %v2392_v20 }
 0x2e5   :  { %1700 = vmatpush3.msra.mxu1 %v2520_v51  ;;  %1734 = vmatprep.subr.mxu0 %v2398_v22 }
 0x2e6   :  { %1701 = vmatprep.subr.mxu1 %v2523_v52  ;;  %1735 = vmatpush3.msra.mxu0 %v2404_v24 }
 0x2e7   :  { %1702 = vmatpush3.msra.mxu1 %v2526_v53  ;;  %1736 = vmatprep.subr.mxu0 %v2410_v26 }
 0x2e8   :  { %1703 = vmatprep.subr.mxu1 %v2528_v54  ;;  %1737 = vmatpush3.msra.mxu0 %v2416_v28 }
 0x2e9   :  { %1704 = vmatpush3.msra.mxu1 %v2530_v55  ;;  %1738 = vmatprep.subr.mxu0 %v2422_v30 }
 0x2ea   :  { %1705 = vmatprep.subr.mxu1 %v2533_v56  ;;  %1739 = vmatpush3.msra.mxu0 %v2428_v32 }
 0x2eb   :  { %1706 = vmatpush3.msra.mxu1 %v2536_v57  ;;  %1740 = vmatprep.subr.mxu0 %v2434_v34 }
 0x2ec   :  { %1707 = vmatprep.subr.mxu1 %v2539_v58  ;;  %1741 = vmatpush3.msra.mxu0 %v2438_v35 }
 0x2ed   :  { %1708 = vmatpush3.msra.mxu1 %v2542_v59  ;;  %1742 = vmatprep.subr.mxu0 %v3080_v36  ;;  %v3091_v36 = vld [vmem:[#allocation32_spill] sm:$0xff] }
 0x2ee   :  { %1709 = vmatprep.subr.mxu1 %v3081_v37  ;;  %1743 = vmatpush3.msra.mxu0 %v3082_v60  ;;  %v3092_v37 = vld [vmem:[#allocation25_spill] sm:$0xff] }
 0x2ef   :  { %1710 = vmatpush3.msra.mxu1 %v3083_v38  ;;  %1744 = vmatprep.subr.mxu0 %v3084_v61 }
 0x2f0   :  { %1711 = vmatprep.subr.mxu1 %v3085_v63  ;;  %1745 = vmatpush3.msra.mxu0 %v3086_v44 }
 0x2f1   :  { %1712 = vmatpush3.msra.mxu1 %v3087_v1  ;;  %1746 = vmatprep.subr.mxu0 %v3088_v39 }
 0x2f2   :  { %1713 = vmatprep.subr.mxu1 %v3089_v41  ;;  %1747 = vmatpush3.msra.mxu0 %v3090_v42 }
 0x2f3   :  { %1714 = vmatpush3.msra.mxu1 %v3091_v36  ;;  %1748 = vmatprep.subr.mxu0 %v3092_v37  ;;  %v744_v37 = vld [vmem:[#allocation4 + $0x20] sm:$0xff] }
 0x2f4   :  { %1749 = vmatpush3.msra.mxu0 %v3077_v62  ;;  %1753 = vmatprep.subr.mxu1 %v3078_v0 }
 0x2f5   :  { %1788 = vmatprep.subr.mxu0 %v3079_v15 }
 0x394   :  { %v1645_v63 = vpop.f32.mrf.mxu1 }
 0x395   :  { %v1680_v44 = vpop.f32.mrf.mxu0 }
 0x396   :  { %v1646_v61 = vpop.f32.mrf.mxu1 }
 0x397   :  { %v1647_v1 = vadd.f32 %v1646_v61, %v1645_v63  ;;  %v1681_v38 = vpop.f32.mrf.mxu0  ;;  %v3097_v61 = vld [vmem:[#allocation21_spill] sm:$0xff] }
 0x398   :  { %v1682_v39 = vadd.f32 %v1681_v38, %v1680_v44  ;;  %v3096_v38 = vld [vmem:[#allocation28_spill] sm:$0xff]  ;;  %v3098_v63 = vld [vmem:[#allocation29_spill] sm:$0xff]  ;;  %v3099_v44 = vld [vmem:[#allocation22_spill] sm:$0xff] }
 0x399   :  { %v595_v41 = vadd.f32 %v1647_v1, %v2639_v40  ;;  %v3100_v1 = vld [vmem:[#allocation30_spill] sm:$0xff] }
 0x39a   :  { %v668_v42 = vadd.f32 %v1682_v39, %v2569_v43  ;;  %v3101_v39 = vld [vmem:[#allocation23_spill] sm:$0xff] }
 0x39b   :  { %2069 = vtanh.f32 %v595_v41  ;;  %v3102_v41 = vld [vmem:[#allocation31_spill] sm:$0xff] }
 0x39c   :  { %2071 = vtanh.f32 %v668_v42  ;;  %v3103_v42 = vld [vmem:[#allocation24_spill] sm:$0xff] }
 0x3a8   :  { %v2070_v36 = vpop.eup %2069 }
 0x3a9   :  { %v2072_v60 = vpop.eup %2071  ;;  %736 = vmatprep.mubr.f32.mxu1 %v2070_v36  ;;  %v3093_v36 = vld [vmem:[#allocation19_spill] sm:$0xff] }
 0x3aa   :  { %737 = vmatmul.mubr.f32.vlgmr.msra.gmra.mxu1 %v2072_v60  ;;  %809 = vmatprep.mubr.f32.mxu0 %v2072_v60  ;;  %v3095_v60 = vld [vmem:[#allocation20_spill] sm:$0xff] }
 0x3ab   :  { %810 = vmatmul.mubr.f32.vlgmr.msra.gmra.mxu0 %v744_v37  ;;  %1754 = vmatpush3.msra.mxu1 %v2381_v16  ;;  %v3094_v37 = vld [vmem:[#allocation27_spill] sm:$0xff] }
 0x3ac   :  { %1755 = vmatprep.subr.mxu1 %v2383_v17  ;;  %1789 = vmatpush3.msra.mxu0 %v2342_v2 }
 0x3ad   :  { %1756 = vmatpush3.msra.mxu1 %v2389_v19  ;;  %1790 = vmatprep.subr.mxu0 %v2344_v3 }
 0x3ae   :  { %1757 = vmatprep.subr.mxu1 %v2395_v21  ;;  %1791 = vmatpush3.msra.mxu0 %v2347_v4 }
 0x3af   :  { %1758 = vmatpush3.msra.mxu1 %v2401_v23  ;;  %1792 = vmatprep.subr.mxu0 %v2350_v5 }
 0x3b0   :  { %1759 = vmatprep.subr.mxu1 %v2407_v25  ;;  %1793 = vmatpush3.msra.mxu0 %v2353_v6 }
 0x3b1   :  { %1760 = vmatpush3.msra.mxu1 %v2413_v27  ;;  %1794 = vmatprep.subr.mxu0 %v2356_v7 }
 0x3b2   :  { %1761 = vmatprep.subr.mxu1 %v2419_v29  ;;  %1795 = vmatpush3.msra.mxu0 %v2359_v8 }
 0x3b3   :  { %1762 = vmatpush3.msra.mxu1 %v2425_v31  ;;  %1796 = vmatprep.subr.mxu0 %v2362_v9 }
 0x3b4   :  { %1763 = vmatprep.subr.mxu1 %v2431_v33  ;;  %1797 = vmatpush3.msra.mxu0 %v2365_v10 }
 0x3b5   :  { %1764 = vmatpush3.msra.mxu1 %v2502_v45  ;;  %1798 = vmatprep.subr.mxu0 %v2368_v11 }
 0x3b6   :  { %1765 = vmatprep.subr.mxu1 %v2505_v46  ;;  %1799 = vmatpush3.msra.mxu0 %v2371_v12 }
 0x3b7   :  { %1766 = vmatpush3.msra.mxu1 %v2508_v47  ;;  %1800 = vmatprep.subr.mxu0 %v2374_v13 }
 0x3b8   :  { %1767 = vmatprep.subr.mxu1 %v2511_v48  ;;  %1801 = vmatpush3.msra.mxu0 %v2376_v14 }
 0x3b9   :  { %1768 = vmatpush3.msra.mxu1 %v2514_v49  ;;  %1802 = vmatprep.subr.mxu0 %v2386_v18 }
 0x3ba   :  { %1769 = vmatprep.subr.mxu1 %v2517_v50  ;;  %1803 = vmatpush3.msra.mxu0 %v2392_v20 }
 0x3bb   :  { %1770 = vmatpush3.msra.mxu1 %v2520_v51  ;;  %1804 = vmatprep.subr.mxu0 %v2398_v22 }
 0x3bc   :  { %1771 = vmatprep.subr.mxu1 %v2523_v52  ;;  %1805 = vmatpush3.msra.mxu0 %v2404_v24 }
 0x3bd   :  { %1772 = vmatpush3.msra.mxu1 %v2526_v53  ;;  %1806 = vmatprep.subr.mxu0 %v2410_v26 }
 0x3be   :  { %1773 = vmatprep.subr.mxu1 %v2528_v54  ;;  %1807 = vmatpush3.msra.mxu0 %v2416_v28 }
 0x3bf   :  { %1774 = vmatpush3.msra.mxu1 %v2530_v55  ;;  %1808 = vmatprep.subr.mxu0 %v2422_v30 }
 0x3c0   :  { %1775 = vmatprep.subr.mxu1 %v2533_v56  ;;  %1809 = vmatpush3.msra.mxu0 %v2428_v32 }
 0x3c1   :  { %1776 = vmatpush3.msra.mxu1 %v2536_v57  ;;  %1810 = vmatprep.subr.mxu0 %v2434_v34 }
 0x3c2   :  { %1777 = vmatprep.subr.mxu1 %v2539_v58  ;;  %1811 = vmatpush3.msra.mxu0 %v2438_v35 }
 0x3c3   :  { %1778 = vmatpush3.msra.mxu1 %v2542_v59  ;;  %1812 = vmatprep.subr.mxu0 %v3093_v36  ;;  %v3104_v36 = vld [vmem:[#allocation32_spill] sm:$0xff] }
 0x3c4   :  { %1779 = vmatprep.subr.mxu1 %v3094_v37  ;;  %1813 = vmatpush3.msra.mxu0 %v3095_v60  ;;  %v3105_v37 = vld [vmem:[#allocation25_spill] sm:$0xff] }
 0x3c5   :  { %1780 = vmatpush3.msra.mxu1 %v3096_v38  ;;  %1814 = vmatprep.subr.mxu0 %v3097_v61 }
 0x3c6   :  { %1781 = vmatprep.subr.mxu1 %v3098_v63  ;;  %1815 = vmatpush3.msra.mxu0 %v3099_v44 }
 0x3c7   :  { %1782 = vmatpush3.msra.mxu1 %v3100_v1  ;;  %1816 = vmatprep.subr.mxu0 %v3101_v39 }
 0x3c8   :  { %1783 = vmatprep.subr.mxu1 %v3102_v41  ;;  %1817 = vmatpush3.msra.mxu0 %v3103_v42 }
 0x3c9   :  { %1784 = vmatpush3.msra.mxu1 %v3104_v36  ;;  %1818 = vmatprep.subr.mxu0 %v3105_v37  ;;  %v888_v37 = vld [vmem:[#allocation4 + $0x28] sm:$0xff] }
 0x3ca   :  { %1819 = vmatpush3.msra.mxu0 %v3077_v62  ;;  %1823 = vmatprep.subr.mxu1 %v3078_v0  ;;  %v2920_v0 = vld [vmem:[#allocation9 + $0x68] sm:$0xff] }
 0x3cb   :  { %1858 = vmatprep.subr.mxu0 %v3079_v15  ;;  %v2101_v15 = vld [vmem:[#allocation7 + $0xe8] sm:$0xff] }
 0x46a   :  { %v1715_v63 = vpop.f32.mrf.mxu1 }
 0x46b   :  { %v1750_v44 = vpop.f32.mrf.mxu0 }
 0x46c   :  { %v1716_v61 = vpop.f32.mrf.mxu1 }
 0x46d   :  { %v1717_v1 = vadd.f32 %v1716_v61, %v1715_v63  ;;  %v1751_v38 = vpop.f32.mrf.mxu0  ;;  %v2107_v61 = vld [vmem:[#allocation7 + $0x60] sm:$0xff]  ;;  %v2932_v63 = vld [vmem:[#allocation9 + $0x58] sm:$0xff] }
 0x46e   :  { %v1752_v39 = vadd.f32 %v1751_v38, %v1750_v44  ;;  %v2929_v38 = vld [vmem:[#allocation9 + $0xd8] sm:$0xff] }
 0x46f   :  { %v739_v41 = vadd.f32 %v1717_v1, %v2639_v40  ;;  %v2109_v44 = vld [vmem:[#allocation7 + $0xd8] sm:$0xff]  ;;  %v2935_v1 = vld [vmem:[#allocation9 + $0xd0] sm:$0xff] }
 0x470   :  { %v812_v42 = vadd.f32 %v1752_v39, %v2569_v43  ;;  %v2111_v39 = vld [vmem:[#allocation7 + $0x58] sm:$0xff] }
 0x471   :  { %2073 = vtanh.f32 %v739_v41  ;;  %v2112_v41 = vld [vmem:[#allocation7 + $0xd0] sm:$0xff] }
 0x472   :  { %2075 = vtanh.f32 %v812_v42  ;;  %v2113_v42 = vld [vmem:[#allocation7 + $0x50] sm:$0xff] }
 0x47e   :  { %v2074_v36 = vpop.eup %2073 }
 0x47f   :  { %v2076_v60 = vpop.eup %2075  ;;  %880 = vmatprep.mubr.f32.mxu1 %v2074_v36  ;;  %v2103_v36 = vld [vmem:[#allocation7 + $0x68] sm:$0xff] }
 0x480   :  { %881 = vmatmul.mubr.f32.vlgmr.msra.gmra.mxu1 %v2076_v60  ;;  %953 = vmatprep.mubr.f32.mxu0 %v2076_v60  ;;  %v2105_v60 = vld [vmem:[#allocation7 + $0xe0] sm:$0xff] }
 0x481   :  { %954 = vmatmul.mubr.f32.vlgmr.msra.gmra.mxu0 %v888_v37  ;;  %1824 = vmatpush3.msra.mxu1 %v2381_v16  ;;  %v2903_v16 = vld [vmem:[#allocation9 + $0xf8] sm:$0xff]  ;;  %v2926_v37 = vld [vmem:[#allocation9 + $0x60] sm:$0xff] }
 0x482   :  { %1825 = vmatprep.subr.mxu1 %v2383_v17  ;;  %1859 = vmatpush3.msra.mxu0 %v2342_v2  ;;  %v3106_v2 = vld [vmem:[#allocation19_spill] sm:$0xff] }
 0x483   :  { %1826 = vmatpush3.msra.mxu1 %v2389_v19  ;;  %1860 = vmatprep.subr.mxu0 %v2344_v3  ;;  %v3107_v3 = vld [vmem:[#allocation27_spill] sm:$0xff] }
 0x484   :  { %1827 = vmatprep.subr.mxu1 %v2395_v21  ;;  %1861 = vmatpush3.msra.mxu0 %v2347_v4  ;;  %v3108_v4 = vld [vmem:[#allocation20_spill] sm:$0xff]  ;;  %v2092_v17 = vld [vmem:[#allocation7 + $0xf8] sm:$0xff] }
 0x485   :  { %1828 = vmatpush3.msra.mxu1 %v2401_v23  ;;  %1862 = vmatprep.subr.mxu0 %v2350_v5  ;;  %v3109_v5 = vld [vmem:[#allocation28_spill] sm:$0xff] }
 0x486   :  { %1829 = vmatprep.subr.mxu1 %v2407_v25  ;;  %1863 = vmatpush3.msra.mxu0 %v2353_v6  ;;  %v3110_v6 = vld [vmem:[#allocation21_spill] sm:$0xff] }
 0x487   :  { %1830 = vmatpush3.msra.mxu1 %v2413_v27  ;;  %1864 = vmatprep.subr.mxu0 %v2356_v7  ;;  %v3111_v7 = vld [vmem:[#allocation29_spill] sm:$0xff]  ;;  %v1032_v27 = vld [vmem:[#allocation4 + $0x30] sm:$0xff] }
 0x488   :  { %1831 = vmatprep.subr.mxu1 %v2419_v29  ;;  %1865 = vmatpush3.msra.mxu0 %v2359_v8  ;;  %v3112_v8 = vld [vmem:[#allocation22_spill] sm:$0xff]  ;;  %v2908_v29 = vld [vmem:[#allocation9 + $0x78] sm:$0xff] }
 0x489   :  { %1832 = vmatpush3.msra.mxu1 %v2425_v31  ;;  %1866 = vmatprep.subr.mxu0 %v2362_v9  ;;  %v3113_v9 = vld [vmem:[#allocation30_spill] sm:$0xff]  ;;  %v2095_v31 = vld [vmem:[#allocation7 + $0x78] sm:$0xff] }
 0x48a   :  { %1833 = vmatprep.subr.mxu1 %v2431_v33  ;;  %1867 = vmatpush3.msra.mxu0 %v2365_v10  ;;  %v3114_v10 = vld [vmem:[#allocation23_spill] sm:$0xff]  ;;  %v2097_v33 = vld [vmem:[#allocation7 + $0xf0] sm:$0xff] }
 0x48b   :  { %1834 = vmatpush3.msra.mxu1 %v2502_v45  ;;  %1868 = vmatprep.subr.mxu0 %v2368_v11  ;;  %v3115_v11 = vld [vmem:[#allocation31_spill] sm:$0xff] }
 0x48c   :  { %1835 = vmatprep.subr.mxu1 %v2505_v46  ;;  %1869 = vmatpush3.msra.mxu0 %v2371_v12  ;;  %v3116_v12 = vld [vmem:[#allocation24_spill] sm:$0xff] }
 0x48d   :  { %1836 = vmatpush3.msra.mxu1 %v2508_v47  ;;  %1870 = vmatprep.subr.mxu0 %v2374_v13  ;;  %v3117_v13 = vld [vmem:[#allocation32_spill] sm:$0xff] }
 0x48e   :  { %1837 = vmatprep.subr.mxu1 %v2511_v48  ;;  %1871 = vmatpush3.msra.mxu0 %v2376_v14  ;;  %v3118_v14 = vld [vmem:[#allocation25_spill] sm:$0xff] }
 0x48f   :  { %1838 = vmatpush3.msra.mxu1 %v2514_v49  ;;  %1872 = vmatprep.subr.mxu0 %v2386_v18 }
 0x490   :  { %1839 = vmatprep.subr.mxu1 %v2517_v50  ;;  %1873 = vmatpush3.msra.mxu0 %v2392_v20 }
 0x491   :  { %1840 = vmatpush3.msra.mxu1 %v2520_v51  ;;  %1874 = vmatprep.subr.mxu0 %v2398_v22 }
 0x492   :  { %1841 = vmatprep.subr.mxu1 %v2523_v52  ;;  %1875 = vmatpush3.msra.mxu0 %v2404_v24 }
 0x493   :  { %1842 = vmatpush3.msra.mxu1 %v2526_v53  ;;  %1876 = vmatprep.subr.mxu0 %v2410_v26 }
 0x494   :  { %1843 = vmatprep.subr.mxu1 %v2528_v54  ;;  %1877 = vmatpush3.msra.mxu0 %v2416_v28 }
 0x495   :  { %1844 = vmatpush3.msra.mxu1 %v2530_v55  ;;  %1878 = vmatprep.subr.mxu0 %v2422_v30  ;;  %v2911_v30 = vld [vmem:[#allocation9 + $0xf0] sm:$0xff] }
 0x496   :  { %1845 = vmatprep.subr.mxu1 %v2533_v56  ;;  %1879 = vmatpush3.msra.mxu0 %v2428_v32  ;;  %v2914_v32 = vld [vmem:[#allocation9 + $0x70] sm:$0xff] }
 0x497   :  { %1846 = vmatpush3.msra.mxu1 %v2536_v57  ;;  %1880 = vmatprep.subr.mxu0 %v2434_v34  ;;  %v2917_v34 = vld [vmem:[#allocation9 + $0xe8] sm:$0xff] }
 0x498   :  { %1847 = vmatprep.subr.mxu1 %v2539_v58  ;;  %1881 = vmatpush3.msra.mxu0 %v2438_v35  ;;  %v2099_v35 = vld [vmem:[#allocation7 + $0x70] sm:$0xff] }
 0x499   :  { %1848 = vmatpush3.msra.mxu1 %v2542_v59  ;;  %1882 = vmatprep.subr.mxu0 %v3106_v2  ;;  %v2114_v2 = vld [vmem:[#allocation7 + $0xc8] sm:$0xff] }
 0x49a   :  { %1849 = vmatprep.subr.mxu1 %v3107_v3  ;;  %1883 = vmatpush3.msra.mxu0 %v3108_v4  ;;  %v2115_v4 = vld [vmem:[#allocation7 + $0x48] sm:$0xff] }
 0x49b   :  { %1850 = vmatpush3.msra.mxu1 %v3109_v5  ;;  %1884 = vmatprep.subr.mxu0 %v3110_v6  ;;  %v2116_v6 = vld [vmem:[#allocation7 + $0xc0] sm:$0xff] }
 0x49c   :  { %1851 = vmatprep.subr.mxu1 %v3111_v7  ;;  %1885 = vmatpush3.msra.mxu0 %v3112_v8  ;;  %v2133_v8 = vld [vmem:[#allocation7] sm:$0xff] }
 0x49d   :  { %1852 = vmatpush3.msra.mxu1 %v3113_v9  ;;  %1886 = vmatprep.subr.mxu0 %v3114_v10 }
 0x49e   :  { %1853 = vmatprep.subr.mxu1 %v3115_v11  ;;  %1887 = vmatpush3.msra.mxu0 %v3116_v12 }
 0x49f   :  { %1854 = vmatpush3.msra.mxu1 %v3117_v13  ;;  %1888 = vmatprep.subr.mxu0 %v3118_v14 }
 0x4a0   :  { %1889 = vmatpush3.msra.mxu0 %v3077_v62  ;;  %1893 = vmatprep.subr.mxu1 %v2903_v16  ;;  %v2923_v62 = vld [vmem:[#allocation9 + $0xe0] sm:$0xff] }
 0x4a1   :  { %1928 = vmatprep.subr.mxu0 %v2092_v17 }
 0x540   :  { %v1785_v18 = vpop.f32.mrf.mxu1 }
 0x541   :  { %v1820_v19 = vpop.f32.mrf.mxu0 }
 0x542   :  { %v1786_v20 = vpop.f32.mrf.mxu1 }
 0x543   :  { %v1787_v21 = vadd.f32 %v1786_v20, %v1785_v18  ;;  %v1821_v22 = vpop.f32.mrf.mxu0 }
 0x544   :  { %v1822_v23 = vadd.f32 %v1821_v22, %v1820_v19  ;;  %v1176_v19 = vld [vmem:[#allocation4 + $0x38] sm:$0xff]  ;;  %v2137_v22 = vld [vmem:[#allocation9 + $0xc0] sm:$0xff] }
 0x545   :  { %v883_v24 = vadd.f32 %v1787_v21, %v2639_v40  ;;  %v2136_v21 = vld [vmem:[#allocation9 + $0x48] sm:$0xff] }
 0x546   :  { %v956_v25 = vadd.f32 %v1822_v23, %v2569_v43  ;;  %v2138_v23 = vld [vmem:[#allocation9 + $0x40] sm:$0xff] }
 0x547   :  { %2077 = vtanh.f32 %v883_v24  ;;  %v2139_v24 = vld [vmem:[#allocation9 + $0xb8] sm:$0xff] }
 0x548   :  { %2079 = vtanh.f32 %v956_v25  ;;  %v2140_v25 = vld [vmem:[#allocation9 + $0x38] sm:$0xff] }
 0x554   :  { %v2078_v26 = vpop.eup %2077 }
 0x555   :  { %v2080_v28 = vpop.eup %2079  ;;  %1024 = vmatprep.mubr.f32.mxu1 %v2078_v26  ;;  %v2141_v26 = vld [vmem:[#allocation9 + $0xb0] sm:$0xff] }
 0x556   :  { %1025 = vmatmul.mubr.f32.vlgmr.msra.gmra.mxu1 %v2080_v28  ;;  %1097 = vmatprep.mubr.f32.mxu0 %v2080_v28  ;;  %v2143_v28 = vld [vmem:[#allocation9 + $0xa8] sm:$0xff] }
 0x557   :  { %1098 = vmatmul.mubr.f32.vlgmr.msra.gmra.mxu0 %v1032_v27  ;;  %1894 = vmatpush3.msra.mxu1 %v2908_v29  ;;  %v2142_v27 = vld [vmem:[#allocation9 + $0x30] sm:$0xff] }
 0x558   :  { %1895 = vmatprep.subr.mxu1 %v2911_v30  ;;  %1929 = vmatpush3.msra.mxu0 %v2095_v31  ;;  %v2146_v31 = vld [vmem:[#allocation9 + $0x20] sm:$0xff] }
 0x559   :  { %1896 = vmatpush3.msra.mxu1 %v2914_v32  ;;  %1930 = vmatprep.subr.mxu0 %v2097_v33  ;;  %v2148_v33 = vld [vmem:[#allocation9 + $0x18] sm:$0xff] }
 0x55a   :  { %1897 = vmatprep.subr.mxu1 %v2917_v34  ;;  %1931 = vmatpush3.msra.mxu0 %v2099_v35  ;;  %v2150_v35 = vld [vmem:[#allocation9 + $0x10] sm:$0xff] }
 0x55b   :  { %1898 = vmatpush3.msra.mxu1 %v2920_v0  ;;  %1932 = vmatprep.subr.mxu0 %v2101_v15  ;;  %v2152_v15 = vld [vmem:[#allocation9 + $0x8] sm:$0xff] }
 0x55c   :  { %1899 = vmatprep.subr.mxu1 %v2923_v62  ;;  %1933 = vmatpush3.msra.mxu0 %v2103_v36  ;;  %v2154_v36 = vld [vmem:[#allocation9] sm:$0xff] }
 0x55d   :  { %1900 = vmatpush3.msra.mxu1 %v2926_v37  ;;  %1934 = vmatprep.subr.mxu0 %v2105_v60  ;;  %v1338_v60 = vld [vmem:[#allocation10 + $0x70] sm:$0xff] }
 0x55e   :  { %1901 = vmatprep.subr.mxu1 %v2929_v38  ;;  %1935 = vmatpush3.msra.mxu0 %v2107_v61  ;;  %v1336_v61 = vld [vmem:[#allocation10 + $0x60] sm:$0xff] }
 0x55f   :  { %1902 = vmatpush3.msra.mxu1 %v2932_v63  ;;  %1936 = vmatprep.subr.mxu0 %v2109_v44 }
 0x560   :  { %1903 = vmatprep.subr.mxu1 %v2935_v1  ;;  %1937 = vmatpush3.msra.mxu0 %v2111_v39 }
 0x561   :  { %1904 = vmatpush3.msra.mxu1 %v2502_v45  ;;  %1938 = vmatprep.subr.mxu0 %v2112_v41  ;;  %v2117_v45 = vld [vmem:[#allocation7 + $0x40] sm:$0xff] }
 0x562   :  { %1905 = vmatprep.subr.mxu1 %v2505_v46  ;;  %1939 = vmatpush3.msra.mxu0 %v2113_v42  ;;  %v2118_v46 = vld [vmem:[#allocation7 + $0xb8] sm:$0xff] }
 0x563   :  { %1906 = vmatpush3.msra.mxu1 %v2508_v47  ;;  %1940 = vmatprep.subr.mxu0 %v2114_v2  ;;  %v2119_v47 = vld [vmem:[#allocation7 + $0x38] sm:$0xff] }
 0x564   :  { %1907 = vmatprep.subr.mxu1 %v2511_v48  ;;  %1941 = vmatpush3.msra.mxu0 %v2115_v4  ;;  %v2120_v48 = vld [vmem:[#allocation7 + $0xb0] sm:$0xff] }
 0x565   :  { %1908 = vmatpush3.msra.mxu1 %v2514_v49  ;;  %1942 = vmatprep.subr.mxu0 %v2116_v6  ;;  %v2121_v49 = vld [vmem:[#allocation7 + $0x30] sm:$0xff]  ;;  %v2155_v6 = vld [vmem:[%s3004_s2] ss:$0 sm:$0xff] }
 0x566   :  { %1909 = vmatprep.subr.mxu1 %v2517_v50  ;;  %1943 = vmatpush3.msra.mxu0 %v2117_v45  ;;  %v2122_v50 = vld [vmem:[#allocation7 + $0xa8] sm:$0xff] }
 0x567   :  { %1910 = vmatpush3.msra.mxu1 %v2520_v51  ;;  %1944 = vmatprep.subr.mxu0 %v2118_v46  ;;  %v2123_v51 = vld [vmem:[#allocation7 + $0x28] sm:$0xff] }
 0x568   :  { %1911 = vmatprep.subr.mxu1 %v2523_v52  ;;  %1945 = vmatpush3.msra.mxu0 %v2119_v47  ;;  %v2124_v52 = vld [vmem:[#allocation7 + $0xa0] sm:$0xff] }
 0x569   :  { %1912 = vmatpush3.msra.mxu1 %v2526_v53  ;;  %1946 = vmatprep.subr.mxu0 %v2120_v48  ;;  %v2125_v53 = vld [vmem:[#allocation7 + $0x20] sm:$0xff]  ;;  %v1334_v48 = vld [vmem:[#allocation10 + $0x50] sm:$0xff] }
 0x56a   :  { %1913 = vmatprep.subr.mxu1 %v2528_v54  ;;  %1947 = vmatpush3.msra.mxu0 %v2121_v49  ;;  %v2126_v54 = vld [vmem:[#allocation7 + $0x98] sm:$0xff]  ;;  %v1333_v49 = vld [vmem:[#allocation10 + $0x48] sm:$0xff] }
 0x56b   :  { %1914 = vmatpush3.msra.mxu1 %v2530_v55  ;;  %1948 = vmatprep.subr.mxu0 %v2122_v50  ;;  %v2127_v55 = vld [vmem:[#allocation7 + $0x18] sm:$0xff] }
 0x56c   :  { %1915 = vmatprep.subr.mxu1 %v2533_v56  ;;  %1949 = vmatpush3.msra.mxu0 %v2123_v51  ;;  %v2128_v56 = vld [vmem:[#allocation7 + $0x90] sm:$0xff]  ;;  %v1331_v50 = vld [vmem:[#allocation10 + $0x38] sm:$0xff] }
 0x56d   :  { %1916 = vmatpush3.msra.mxu1 %v2536_v57  ;;  %1950 = vmatprep.subr.mxu0 %v2124_v52  ;;  %v2129_v57 = vld [vmem:[#allocation7 + $0x10] sm:$0xff]  ;;  %v1329_v52 = vld [vmem:[#allocation10 + $0x28] sm:$0xff] }
 0x56e   :  { %1917 = vmatprep.subr.mxu1 %v2539_v58  ;;  %1951 = vmatpush3.msra.mxu0 %v2125_v53  ;;  %v2130_v58 = vld [vmem:[#allocation7 + $0x88] sm:$0xff]  ;;  %v1330_v51 = vld [vmem:[#allocation10 + $0x30] sm:$0xff]  ;;  %v1328_v53 = vld [vmem:[#allocation10 + $0x20] sm:$0xff] }
 0x56f   :  { %1918 = vmatpush3.msra.mxu1 %v2542_v59  ;;  %1952 = vmatprep.subr.mxu0 %v2126_v54  ;;  %v2131_v59 = vld [vmem:[#allocation7 + $0x8] sm:$0xff]  ;;  %v1327_v54 = vld [vmem:[#allocation10 + $0x18] sm:$0xff] }
 0x570   :  { %1919 = vmatprep.subr.mxu1 %v3107_v3  ;;  %1953 = vmatpush3.msra.mxu0 %v2127_v55  ;;  %v2132_v3 = vld [vmem:[#allocation7 + $0x80] sm:$0xff]  ;;  %v1326_v55 = vld [vmem:[#allocation10 + $0x10] sm:$0xff] }
 0x571   :  { %1920 = vmatpush3.msra.mxu1 %v3109_v5  ;;  %1954 = vmatprep.subr.mxu0 %v2128_v56  ;;  %v3119_v5 = vmov 0.0   ;;  %v1325_v56 = vld [vmem:[#allocation10 + $0x8] sm:$0xff] }
 0x572   :  { %1921 = vmatprep.subr.mxu1 %v3111_v7  ;;  %1955 = vmatpush3.msra.mxu0 %v2129_v57  ;;  %v1324_v57 = vld [vmem:[#allocation10] sm:$0xff] }
 0x573   :  { %1922 = vmatpush3.msra.mxu1 %v3113_v9  ;;  %1956 = vmatprep.subr.mxu0 %v2130_v58 }
 0x574   :  { %1923 = vmatprep.subr.mxu1 %v3115_v11  ;;  %1957 = vmatpush3.msra.mxu0 %v2131_v59 }
 0x575   :  { %1924 = vmatpush3.msra.mxu1 %v3117_v13  ;;  %1958 = vmatprep.subr.mxu0 %v2132_v3 }
 0x576   :  { %1959 = vmatpush3.msra.mxu0 %v2133_v8  ;;  %1963 = vmatprep.subr.mxu1 %v2903_v16  ;;  %v2135_v16 = vld [vmem:[#allocation9 + $0xc8] sm:$0xff]  ;;  %v2156_v8 = vld [vmem:[%s3006_s4] ss:$0 sm:$0xff] }
 0x577   :  { %2015 = vmatprep.subr.mxu0 %v3119_v5 }
 0x616   :  { %v1855_v7 = vpop.f32.mrf.mxu1 }
 0x617   :  { %v1890_v10 = vpop.f32.mrf.mxu0 }
 0x618   :  { %v1856_v12 = vpop.f32.mrf.mxu1 }
 0x619   :  { %v1857_v9 = vadd.f32 %v1856_v12, %v1855_v7  ;;  %v1891_v14 = vpop.f32.mrf.mxu0  ;;  %v1437_v12 = vld [vmem:[%s3008_s6] ss:$0 sm:$0xff] }
 0x61a   :  { %v1892_v17 = vadd.f32 %v1891_v14, %v1890_v10 }
 0x61b   :  { %v1027_v11 = vadd.f32 %v1857_v9, %v2639_v40 }
 0x61c   :  { %v1100_v18 = vadd.f32 %v1892_v17, %v2569_v43  ;;  %v2134_v43 = vld [vmem:[#allocation9 + $0x50] sm:$0xff] }
 0x61d   :  { %2081 = vtanh.f32 %v1027_v11 }
 0x61e   :  { %2083 = vtanh.f32 %v1100_v18 }
 0x62a   :  { %v2082_v13 = vpop.eup %2081 }
 0x62b   :  { %v2084_v20 = vpop.eup %2083  ;;  %1168 = vmatprep.mubr.f32.mxu1 %v2082_v13 }
 0x62c   :  { %1169 = vmatmul.mubr.f32.vlgmr.msra.gmra.mxu1 %v2084_v20  ;;  %1241 = vmatprep.mubr.f32.mxu0 %v2084_v20 }
 0x62d   :  { %1242 = vmatmul.mubr.f32.vlgmr.msra.gmra.mxu0 %v1176_v19  ;;  %1964 = vmatpush3.msra.mxu1 %v2908_v29  ;;  %v2144_v29 = vld [vmem:[#allocation9 + $0x28] sm:$0xff] }
 0x62e   :  { %1965 = vmatprep.subr.mxu1 %v2911_v30  ;;  %v2145_v30 = vld [vmem:[#allocation9 + $0xa0] sm:$0xff]  ;;  %2047 = vmatprep.mubr.msk.f32.mxu0 %vm2272_vm0, %v3119_v5 }
 0x62f   :  { %1966 = vmatpush3.msra.mxu1 %v2914_v32  ;;  %v2147_v32 = vld [vmem:[#allocation9 + $0x98] sm:$0xff] }
 0x630   :  { %1967 = vmatprep.subr.mxu1 %v2917_v34  ;;  %v2149_v34 = vld [vmem:[#allocation9 + $0x90] sm:$0xff] }
 0x631   :  { %1968 = vmatpush3.msra.mxu1 %v2920_v0  ;;  %v2151_v0 = vld [vmem:[#allocation9 + $0x88] sm:$0xff] }
 0x632   :  { %1969 = vmatprep.subr.mxu1 %v2923_v62  ;;  %v2153_v62 = vld [vmem:[#allocation9 + $0x80] sm:$0xff] }
 0x633   :  { %1970 = vmatpush3.msra.mxu1 %v2926_v37  ;;  %v1339_v37 = vld [vmem:[#allocation10 + $0x78] sm:$0xff] }
 0x634   :  { %1971 = vmatprep.subr.mxu1 %v2929_v38  ;;  %2016 = vmatpush3.msra.mxu0 %v1339_v37  ;;  %v1337_v38 = vld [vmem:[#allocation10 + $0x68] sm:$0xff] }
 0x635   :  { %1972 = vmatpush3.msra.mxu1 %v2932_v63  ;;  %2017 = vmatprep.subr.mxu0 %v3119_v5  ;;  %v1335_v63 = vld [vmem:[#allocation10 + $0x58] sm:$0xff] }
 0x636   :  { %1973 = vmatprep.subr.mxu1 %v2935_v1  ;;  %2018 = vmatpush3.msra.mxu0 %v1338_v60 }
 0x637   :  { %1974 = vmatpush3.msra.mxu1 %v2134_v43  ;;  %2019 = vmatprep.subr.mxu0 %v3119_v5 }
 0x638   :  { %1975 = vmatprep.subr.mxu1 %v2135_v16  ;;  %2020 = vmatpush3.msra.mxu0 %v1337_v38 }
 0x639   :  { %1976 = vmatpush3.msra.mxu1 %v2136_v21  ;;  %2021 = vmatprep.subr.mxu0 %v3119_v5 }
 0x63a   :  { %1977 = vmatprep.subr.mxu1 %v2137_v22  ;;  %2022 = vmatpush3.msra.mxu0 %v1336_v61 }
 0x63b   :  { %1978 = vmatpush3.msra.mxu1 %v2138_v23  ;;  %2023 = vmatprep.subr.mxu0 %v3119_v5 }
 0x63c   :  { %1979 = vmatprep.subr.mxu1 %v2139_v24  ;;  %2024 = vmatpush3.msra.mxu0 %v1335_v63 }
 0x63d   :  { %1980 = vmatpush3.msra.mxu1 %v2140_v25  ;;  %2025 = vmatprep.subr.mxu0 %v3119_v5 }
 0x63e   :  { %1981 = vmatprep.subr.mxu1 %v2141_v26  ;;  %2026 = vmatpush3.msra.mxu0 %v1334_v48 }
 0x63f   :  { %1982 = vmatpush3.msra.mxu1 %v2142_v27  ;;  %2027 = vmatprep.subr.mxu0 %v3119_v5 }
 0x640   :  { %1983 = vmatprep.subr.mxu1 %v2143_v28  ;;  %2028 = vmatpush3.msra.mxu0 %v1333_v49 }
 0x641   :  { %1984 = vmatpush3.msra.mxu1 %v2144_v29  ;;  %2029 = vmatprep.subr.mxu0 %v3119_v5 }
 0x642   :  { %1985 = vmatprep.subr.mxu1 %v2145_v30 }
 0x643   :  { %1986 = vmatpush3.msra.mxu1 %v2146_v31 }
 0x644   :  { %1987 = vmatprep.subr.mxu1 %v2147_v32 }
 0x645   :  { %1988 = vmatpush3.msra.mxu1 %v2148_v33 }
 0x646   :  { %1989 = vmatprep.subr.mxu1 %v2149_v34 }
 0x647   :  { %1990 = vmatpush3.msra.mxu1 %v2150_v35 }
 0x648   :  { %1991 = vmatprep.subr.mxu1 %v2151_v0 }
 0x649   :  { %1992 = vmatpush3.msra.mxu1 %v2152_v15 }
 0x64a   :  { %1993 = vmatprep.subr.mxu1 %v2153_v62 }
 0x64b   :  { %1994 = vmatpush3.msra.mxu1 %v2154_v36 }
 0x6ec   :  { %v1925_v44 = vpop.f32.mrf.mxu1 }
 0x6ed   :  { %v1960_v1 = vpop.f32.mrf.mxu0 }
 0x6ee   :  { %v1926_v39 = vpop.f32.mrf.mxu1 }
 0x6ef   :  { %v1927_v41 = vadd.f32 %v1926_v39, %v1925_v44  ;;  %v1961_v42 = vpop.f32.mrf.mxu0 }
 0x6f0   :  { %v1962_v2 = vadd.f32 %v1961_v42, %v1960_v1 }
 0x6f1   :  { %v1171_v4 = vadd.f32 %v1927_v41, %v2639_v40  ;;  %v1332_v40 = vld [vmem:[#allocation10 + $0x40] sm:$0xff] }
 0x6f2   :  { %v1244_v45 = vadd.f32 %v2155_v6, %v1962_v2  ;;  %2030 = vmatpush3.msra.mxu0 %v1332_v40 }
 0x6f3   :  { %2085 = vtanh.f32 %v1171_v4  ;;  %2031 = vmatprep.subr.mxu0 %v3119_v5 }
 0x6f4   :  { %2087 = vtanh.f32 %v1244_v45  ;;  %2032 = vmatpush3.msra.mxu0 %v1331_v50 }
 0x6f5   :  { %2033 = vmatprep.subr.mxu0 %v3119_v5 }
 0x6f6   :  { %2034 = vmatpush3.msra.mxu0 %v1330_v51 }
 0x6f7   :  { %2035 = vmatprep.subr.mxu0 %v3119_v5 }
 0x6f8   :  { %2036 = vmatpush3.msra.mxu0 %v1329_v52 }
 0x6f9   :  { %2037 = vmatprep.subr.mxu0 %v3119_v5 }
 0x6fa   :  { %2038 = vmatpush3.msra.mxu0 %v1328_v53 }
 0x6fb   :  { %2039 = vmatprep.subr.mxu0 %v3119_v5 }
 0x6fc   :  { %2040 = vmatpush3.msra.mxu0 %v1327_v54 }
 0x6fd   :  { %2041 = vmatprep.subr.mxu0 %v3119_v5 }
 0x6fe   :  { %2042 = vmatpush3.msra.mxu0 %v1326_v55 }
 0x6ff   :  { %2043 = vmatprep.subr.mxu0 %v3119_v5 }
 0x700   :  { %v2086_v46 = vpop.eup %2085  ;;  %2044 = vmatpush3.msra.mxu0 %v1325_v56 }
 0x701   :  { %v2088_v47 = vpop.eup %2087  ;;  %1312 = vmatprep.mubr.f32.mxu1 %v2086_v46  ;;  %2045 = vmatprep.subr.mxu0 %v3119_v5 }
 0x702   :  { %1313 = vmatmul.mubr.f32.vlgmr.msra.gmra.mxu1 %v2088_v47  ;;  %2046 = vmatpush3.msra.mxu0 %v1324_v57 }
 0x7c2   :  { %v1995_v58 = vpop.f32.mrf.mxu1 }
 0x7c4   :  { %v1996_v59 = vpop.f32.mrf.mxu1 }
 0x7c5   :  { %v1997_v3 = vadd.f32 %v1996_v59, %v1995_v58 }
 0x7c7   :  { %v1315_v7 = vadd.f32 %v2156_v8, %v1997_v3 }
 0x7c9   :  { %2089 = vtanh.f32 %v1315_v7 }
 0x7d6   :  { %v2090_v10 = vpop.eup %2089 }
 0x7d7   :  { %2048 = vmatmul.mubr.f32.vlgmr.msra.gmra.mxu0 %v2090_v10 }
 0x897   :  { %v1413_v9 = vpop.f32.mrf.mxu0 }
 0x898   :  { %v1414_v5 = vadd.f32 %v1437_v12, %v1413_v9 }
 0x899   :  { %v2049_v14 = vpop.f32.mrf.mxu0 }
 0x89a   :  { %1417 = vst [vmem:[#allocation12] sm:$0xff] %v1414_v5 }
 0x89b   :  { %2248 = shalt.err (!%p2245_p10)
}
 0x89c   :  { %1427 = dma.vmem_to_hbm [thread:$0]  %s1425_s29, 128, %s3009_s7, [#allocation6]  }
 0x89d   :  { %2263 = dma.done.wait [#allocation6], 128  }
 0x89e   :  { %2264 = vsyncadd [#allocation6], 4294967168 }
 0x89f   :  { %1431 = vsyncpa [#allocation5], 1 }
 0x8a0   :  { %1432 = vsyncpa [#allocation8], 1 }
 0x8a1   :  { %1433 = vsyncpa [#allocation11], 1 }
 0x8a2   :  { %1434 = vsyncpa [#allocation6], 1 }

</bundles_post_ra>
